<compile_context>
chip_gen: v5e
topology: v5e:2x2
jax: 0.10.0
libtpu: 0.0.40
codegen_flags: <defaults>
</compile_context>

<pallas_src>
import jax
import jax.numpy as jnp
from jax import lax
from jax.experimental import pallas as pl
from jax.experimental.pallas import tpu as pltpu


# ------------------------------ small helpers -------------------------------

def _round_up(x, m):
    return (x + m - 1) // m * m


def _col_tiling(m, cap=2048):
    """Pick a lane (column) tile for a (rows, m) slab.  Keeps >=2 grid steps
    whenever m >= 256 (v7x has two TensorCores) and 512-2048 lane tiles on the
    big levels (amortizes the per-grid-step overhead)."""
    if m < 256:
        return m, 1
    if m >= 4096:
        t = 2048
    elif m >= 2048:
        t = 1024
    elif m >= 1024:
        t = 512
    elif m >= 512:
        t = 256
    else:
        t = 128
    t = min(t, cap)
    return t, -(-m // t)


def _to_cm(x_ncdhw):
    n, c, d, h, w = x_ncdhw.shape
    return (jnp.transpose(x_ncdhw, (1, 0, 2, 3, 4)).reshape(c, n * d * h * w),
            (n, d, h, w))


def _from_cm(x_cm, spatial):
    n, d, h, w = spatial
    return jnp.transpose(x_cm.reshape(-1, n, d, h, w), (1, 0, 2, 3, 4))


# ------------------------------ Pallas kernels -------------------------------

def pallas_matmul_t(x, w, b, alpha, *, out_dtype, fuse_softmax=False):
    """Lane-dense fused kernel:  y = PReLU(w @ x + b)  (optional channel softmax).

    x: (K, M)   w: (Cout, K)   b, alpha: (Cout,)   ->  (Cout, M) in out_dtype.
    The flattened spatial dim M sits in the lane dimension (lane-dense stores).
    """
    k, m = x.shape
    cout = w.shape[0]
    tm, t = _col_tiling(m)
    mp = tm * t
    if mp != m:
        x = jnp.pad(x, ((0, 0), (0, mp - m)))

    def kernel(x_ref, w_ref, b_ref, a_ref, o_ref):
        y = jnp.dot(w_ref[...], x_ref[...], preferred_element_type=jnp.float32)
        y = y + b_ref[...]
        y = jnp.where(y > 0.0, y, a_ref[...] * y)
        if fuse_softmax:
            mx = jnp.max(y, axis=0, keepdims=True)
            e = jnp.exp(y - mx)
            y = e / jnp.sum(e, axis=0, keepdims=True)
        o_ref[...] = y.astype(o_ref.dtype)

    out = pl.pallas_call(
        kernel,
        out_shape=jax.ShapeDtypeStruct((cout, mp), out_dtype),
        grid=(t,),
        in_specs=[
            pl.BlockSpec((k, tm), lambda j: (0, j)),
            pl.BlockSpec((cout, k), lambda j: (0, 0)),
            pl.BlockSpec((cout, 1), lambda j: (0, 0)),
            pl.BlockSpec((cout, 1), lambda j: (0, 0)),
        ],
        out_specs=pl.BlockSpec((cout, tm), lambda j: (0, j)),
        compiler_params=pltpu.CompilerParams(dimension_semantics=("parallel",)),
    )(x, w, b.reshape(cout, 1).astype(jnp.float32),
      alpha.reshape(cout, 1).astype(jnp.float32))
    return out[:, :m]


def pallas_channel_softmax(x):
    """Softmax over the (small) channel axis of a (C, M) slab, lane-dense in M."""
    c, m = x.shape
    tm, t = _col_tiling(m)
    mp = tm * t
    xp = jnp.pad(x, ((0, 0), (0, mp - m))) if mp != m else x

    def kernel(x_ref, o_ref):
        v = x_ref[...].astype(jnp.float32)
        mx = jnp.max(v, axis=0, keepdims=True)
        e = jnp.exp(v - mx)
        o_ref[...] = e / jnp.sum(e, axis=0, keepdims=True)

    out = pl.pallas_call(
        kernel,
        out_shape=jax.ShapeDtypeStruct((c, mp), jnp.float32),
        grid=(t,),
        in_specs=[pl.BlockSpec((c, tm), lambda j: (0, j))],
        out_specs=pl.BlockSpec((c, tm), lambda j: (0, j)),
        compiler_params=pltpu.CompilerParams(dimension_semantics=("parallel",)),
    )(xp)
    return out[:, :m]


def conv3x3_pallas(xs, ws, b, alpha, spatial, *, out_dtype, residual_from=None):
    """3x3x3 'same' conv + PReLU in (C, M) layout, no materialized im2col.

    xs: list of activations (Ci, M), M = N*D*H*W (same spatial grid).  More
        than one entry emulates torch.cat([...], dim=1) without writing the
        concatenated tensor to HBM (the kernel accumulates 27 taps per input).
    ws: matching torch-layout weights (Cout, Ci, 3, 3, 3).
    residual_from: index i -> adds xs[i] (channel-broadcast) after the PReLU,
        emulating `encoder(x) + x`.
    """
    n, d, h, w = spatial
    m = n * d * h * w
    cout = ws[0].shape[0]
    dp, hp, wp = d + 2, h + 2, w + 2
    mp = n * dp * hp * wp                       # outputs computed on padded grid
    tm, t = _col_tiling(mp, cap=1024)
    mp_r = tm * t
    dmax = hp * wp + wp + 1                     # largest |tap offset|
    halo = _round_up(dmax, 128)
    width = tm + 2 * halo

    # tap flat offsets in padded space; tap index = kd*9 + kh*3 + kw
    offs = [(kd - 1) * hp * wp + (kh - 1) * wp + (kw - 1)
            for kd in range(3) for kh in range(3) for kw in range(3)]

    wins, wmats, cins = [], [], []
    for x, wgt in zip(xs, ws):
        ci = x.shape[0]
        cip = max(8, _round_up(ci, 8))          # avoid degenerate contraction dim
        xv = x.astype(jnp.float32).reshape(ci, n, d, h, w)
        xv = jnp.pad(xv, ((0, cip - ci), (0, 0), (1, 1), (1, 1), (1, 1)))
        xf = xv.reshape(cip, mp)
        xf = jnp.pad(xf, ((0, 0), (halo, halo + mp_r - mp)))
        # overlapping per-grid-step column windows (tiny; VMEM resident per step)
        win = jnp.stack([xf[:, j * tm:j * tm + width] for j in range(t)], axis=0)
        wins.append(win)
        wm = jnp.transpose(wgt, (2, 3, 4, 0, 1)).reshape(27, cout, ci)
        wm = jnp.pad(wm, ((0, 0), (0, 0), (0, cip - ci))).astype(jnp.float32)
        wmats.append(wm)
        cins.append((ci, cip))
    n_in = len(xs)

    def kernel(*refs):
        x_refs = refs[:n_in]
        w_refs = refs[n_in:2 * n_in]
        b_ref, a_ref, o_ref = refs[2 * n_in:]
        acc = jnp.zeros((cout, tm), jnp.float32)
        for x_ref, w_ref in zip(x_refs, w_refs):
            for tap, off in enumerate(offs):
                s = halo + off                  # static lane offset of this tap
                acc = acc + jnp.dot(w_ref[tap], x_ref[:, s:s + tm],
                                    preferred_element_type=jnp.float32)
        y = acc + b_ref[...]
        y = jnp.where(y > 0.0, y, a_ref[...] * y)
        if residual_from is not None:
            cr = cins[residual_from][0]
            y = y + x_refs[residual_from][0:cr, halo:halo + tm]
        o_ref[...] = y.astype(o_ref.dtype)

    in_specs = (
        [pl.BlockSpec((None, cip, width), lambda j: (j, 0, 0))
         for (_, cip) in cins]
        + [pl.BlockSpec((27, cout, cip), lambda j: (0, 0, 0))
           for (_, cip) in cins]
        + [pl.BlockSpec((cout, 1), lambda j: (0, 0)),
           pl.BlockSpec((cout, 1), lambda j: (0, 0))]
    )
    out = pl.pallas_call(
        kernel,
        out_shape=jax.ShapeDtypeStruct((cout, mp_r), out_dtype),
        grid=(t,),
        in_specs=in_specs,
        out_specs=pl.BlockSpec((cout, tm), lambda j: (0, j)),
        compiler_params=pltpu.CompilerParams(dimension_semantics=("parallel",)),
    )(*wins, *wmats, b.reshape(cout, 1).astype(jnp.float32),
      alpha.reshape(cout, 1).astype(jnp.float32))

    # drop the padded (garbage) positions: keep the interior of the padded grid
    y = out[:, :mp].reshape(cout, n, dp, hp, wp)[:, :, 1:-1, 1:-1, 1:-1]
    return y.reshape(cout, m)


# ------------------------------ layer wrappers -------------------------------

def conv3d_k2s2(x, p, spatial, cdtype):
    """2x2x2 stride-2 conv + PReLU on a (Cin, M) slab.  The non-overlapping
    space-to-depth is a pure permutation (no im2col duplication)."""
    n, d, h, w = spatial
    ci = x.shape[0]
    co = p["w"].shape[0]
    do, ho, wo = d // 2, h // 2, w // 2
    xv = x.reshape(ci, n, do, 2, ho, 2, wo, 2)
    x8 = jnp.transpose(xv, (3, 5, 7, 0, 1, 2, 4, 6)).reshape(
        8 * ci, n * do * ho * wo)                             # rows: (kd,kh,kw,ci)
    w8 = jnp.transpose(p["w"], (0, 2, 3, 4, 1)).reshape(co, 8 * ci)
    y = pallas_matmul_t(x8.astype(cdtype), w8.astype(cdtype),
                        p["b"], p["alpha"], out_dtype=cdtype)
    return y, (n, do, ho, wo)


def convtrans3d_k2s2(x, p, spatial, cdtype):
    """ConvTranspose3d(kernel=2, stride=2) + PReLU on a (Cin, M) slab."""
    n, d, h, w = spatial
    ci = x.shape[0]
    co = p["w"].shape[1]                          # torch layout (Cin, Cout, 2,2,2)
    w8 = jnp.transpose(p["w"], (2, 3, 4, 1, 0)).reshape(8 * co, ci)
    b8 = jnp.tile(p["b"], 8)
    a8 = jnp.tile(p["alpha"], 8)
    y8 = pallas_matmul_t(x.astype(cdtype), w8.astype(cdtype), b8, a8,
                         out_dtype=cdtype)        # (8*Cout, Mi), rows (kd,kh,kw,co)
    yv = y8.reshape(2, 2, 2, co, n, d, h, w)
    yv = jnp.transpose(yv, (3, 4, 5, 0, 6, 1, 7, 2))  # (co, n, d, kd, h, kh, w, kw)
    return yv.reshape(co, n * 8 * d * h * w), (n, 2 * d, 2 * h, 2 * w)


def _interp_axis(x, axis, out_size):
    in_size = x.shape[axis]
    dst = jnp.arange(out_size, dtype=jnp.float32)
    src = jnp.clip((dst + 0.5) * (in_size / out_size) - 0.5, 0.0, in_size - 1.0)
    i0 = jnp.floor(src).astype(jnp.int32)
    i1 = jnp.minimum(i0 + 1, in_size - 1)
    w1 = src - i0.astype(jnp.float32)
    x0 = jnp.take(x, i0, axis=axis)
    x1 = jnp.take(x, i1, axis=axis)
    shp = [1] * x.ndim
    shp[axis] = out_size
    w1 = w1.reshape(shp)
    return x0 * (1.0 - w1) + x1 * w1


def map_head(x, p, spatial, scale, cdtype):
    """1x1x1 conv -> trilinear upsample -> channel softmax (softmax fused into
    the conv epilogue when scale == 1, i.e. no upsample in between)."""
    n, d, h, w = spatial
    ci = x.shape[0]
    co = p["w"].shape[0]
    wm = p["w"].reshape(co, ci)
    ident = jnp.ones((co,), jnp.float32)           # PReLU(alpha=1) == identity
    if scale == 1:
        return pallas_matmul_t(x.astype(cdtype), wm.astype(cdtype), p["b"], ident,
                               out_dtype=jnp.float32, fuse_softmax=True)
    logits = pallas_matmul_t(x.astype(cdtype), wm.astype(cdtype), p["b"], ident,
                             out_dtype=jnp.float32)
    lv = logits.reshape(co, n, d, h, w)
    # TODO(synk): trilinear upsample stays in JAX glue (gather + lerp).
    lv = _interp_axis(lv, 2, d * scale)
    lv = _interp_axis(lv, 3, h * scale)
    lv = _interp_axis(lv, 4, w * scale)
    return pallas_channel_softmax(lv.reshape(co, -1))


def dropout(x, rate, training, key):
    # TODO(synk): torch RNG stream cannot be reproduced; uses a JAX PRNG mask.
    if not training:
        return x
    keep = 1.0 - rate
    mask = jax.random.bernoulli(key, keep, x.shape)
    return jnp.where(mask, x / keep, 0.0).astype(x.dtype)


# -------------------------------- parameters ---------------------------------

def init_params(key, in_channel=1, out_channel=2):
    def conv(k, cout, cin, ks):
        kw, kb = jax.random.split(k)
        fan = cin * ks ** 3
        return {"w": jax.random.normal(kw, (cout, cin, ks, ks, ks), jnp.float32)
                     / jnp.sqrt(float(fan)),
                "b": 0.05 * jax.random.normal(kb, (cout,), jnp.float32)}

    def convT(k, cin, cout, ks):
        kw, kb = jax.random.split(k)
        fan = cout * ks ** 3
        return {"w": jax.random.normal(kw, (cin, cout, ks, ks, ks), jnp.float32)
                     / jnp.sqrt(float(fan)),
                "b": 0.05 * jax.random.normal(kb, (cout,), jnp.float32)}

    def prelu(c):
        return 0.25 * jnp.ones((c,), jnp.float32)   # PyTorch PReLU default init

    ks = jax.random.split(key, 15)
    p = {}
    p["enc1"] = conv(ks[0], 2, in_channel, 3);  p["enc1"]["alpha"] = prelu(2)
    p["down1"] = conv(ks[1], 4, 2, 2);          p["down1"]["alpha"] = prelu(4)
    p["down2"] = conv(ks[2], 6, 4, 2);          p["down2"]["alpha"] = prelu(6)
    p["down3"] = conv(ks[3], 8, 6, 2);          p["down3"]["alpha"] = prelu(8)
    p["down4"] = conv(ks[4], 10, 8, 3);         p["down4"]["alpha"] = prelu(10)
    p["up2"] = convT(ks[5], 10, 4, 2);          p["up2"]["alpha"] = prelu(4)
    p["up3"] = convT(ks[6], 12, 4, 2);          p["up3"]["alpha"] = prelu(4)
    p["up4"] = convT(ks[7], 12, 4, 2);          p["up4"]["alpha"] = prelu(4)
    p["dec2"] = conv(ks[8], 12, 2 + 8, 3);      p["dec2"]["alpha"] = prelu(12)
    p["dec3"] = conv(ks[9], 12, 4 + 4, 3);      p["dec3"]["alpha"] = prelu(12)
    p["dec4"] = conv(ks[10], 12, 4 + 2, 3);     p["dec4"]["alpha"] = prelu(12)
    p["map1"] = conv(ks[11], out_channel, 10, 1)
    p["map2"] = conv(ks[12], out_channel, 12, 1)
    p["map3"] = conv(ks[13], out_channel, 12, 1)
    p["map4"] = conv(ks[14], out_channel, 12, 1)
    return p


# ---------------------------------- forward ----------------------------------

def resunet_forward(params, x_ncdhw, drop_key, training=True,
                    cdtype=jnp.bfloat16):
    drop_rate = 0.2
    dk1, dk2 = jax.random.split(drop_key)
    p = params
    x, sp0 = _to_cm(x_ncdhw.astype(jnp.float32))
    x = x.astype(cdtype)

    # encoder ------------------------------------------------------------------
    long_range1 = conv3x3_pallas([x], [p["enc1"]["w"]], p["enc1"]["b"],
                                 p["enc1"]["alpha"], sp0, out_dtype=cdtype,
                                 residual_from=0)             # conv + PReLU + x
    short_range1, sp1 = conv3d_k2s2(long_range1, p["down1"], sp0, cdtype)
    short_range2, sp2 = conv3d_k2s2(short_range1, p["down2"], sp1, cdtype)
    short_range3, sp3 = conv3d_k2s2(short_range2, p["down3"], sp2, cdtype)
    outputs = conv3x3_pallas([short_range3], [p["down4"]["w"]], p["down4"]["b"],
                             p["down4"]["alpha"], sp3, out_dtype=cdtype)

    output1 = map_head(outputs, p["map1"], sp3, 8, cdtype)

    # decoder ------------------------------------------------------------------
    short_range6, sp6 = convtrans3d_k2s2(outputs, p["up2"], sp3, cdtype)
    c1 = short_range6.shape[0]
    outputs = conv3x3_pallas([short_range6, short_range2],
                             [p["dec2"]["w"][:, :c1], p["dec2"]["w"][:, c1:]],
                             p["dec2"]["b"], p["dec2"]["alpha"], sp6,
                             out_dtype=cdtype)                # fused concat-conv
    outputs = dropout(outputs, drop_rate, training, dk1)
    output2 = map_head(outputs, p["map2"], sp6, 4, cdtype)

    short_range7, sp7 = convtrans3d_k2s2(outputs, p["up3"], sp6, cdtype)
    c1 = short_range7.shape[0]
    outputs = conv3x3_pallas([short_range7, short_range1],
                             [p["dec3"]["w"][:, :c1], p["dec3"]["w"][:, c1:]],
                             p["dec3"]["b"], p["dec3"]["alpha"], sp7,
                             out_dtype=cdtype)
    outputs = dropout(outputs, drop_rate, training, dk2)
    output3 = map_head(outputs, p["map3"], sp7, 2, cdtype)

    short_range8, sp8 = convtrans3d_k2s2(outputs, p["up4"], sp7, cdtype)
    c1 = short_range8.shape[0]
    outputs = conv3x3_pallas([short_range8, long_range1],
                             [p["dec4"]["w"][:, :c1], p["dec4"]["w"][:, c1:]],
                             p["dec4"]["b"], p["dec4"]["alpha"], sp8,
                             out_dtype=cdtype)
    output4 = map_head(outputs, p["map4"], sp8, 1, cdtype)

    if training:
        return tuple(_from_cm(o, sp0)
                     for o in (output1, output2, output3, output4))
    return _from_cm(output4, sp0)


# ------------------------------ reference checks ------------------------------

def _ref_conv3x3(x, w, b, alpha, residual=False):
    y = lax.conv_general_dilated(x, w, (1, 1, 1), [(1, 1)] * 3,
                                 dimension_numbers=("NCDHW", "OIDHW", "NCDHW"),
                                 precision=lax.Precision.HIGHEST)
    y = y + b.reshape(1, -1, 1, 1, 1)
    a = alpha.reshape(1, -1, 1, 1, 1)
    y = jnp.where(y > 0, y, a * y)
    return y + x if residual else y


def _ref_conv_k2s2(x, w, b, alpha):
    y = lax.conv_general_dilated(x, w, (2, 2, 2), "VALID",
                                 dimension_numbers=("NCDHW", "OIDHW", "NCDHW"),
                                 precision=lax.Precision.HIGHEST)
    y = y + b.reshape(1, -1, 1, 1, 1)
    a = alpha.reshape(1, -1, 1, 1, 1)
    return jnp.where(y > 0, y, a * y)


def _ref_convtrans_k2s2(x, w, b, alpha):
    n, ci, d, h, wd = x.shape
    co = w.shape[1]
    y = jnp.einsum("nidhw,iokpq->nodkhpwq", x, w,
                   precision=lax.Precision.HIGHEST)
    y = y.reshape(n, co, 2 * d, 2 * h, 2 * wd)
    y = y + b.reshape(1, -1, 1, 1, 1)
    a = alpha.reshape(1, -1, 1, 1, 1)
    return jnp.where(y > 0, y, a * y)


def _self_test():
    """Check the Pallas building blocks (f32 compute path) against lax/einsum."""
    k = jax.random.split(jax.random.PRNGKey(42), 8)
    f32 = jnp.float32

    # 3x3x3 conv + PReLU (single input)
    x = jax.random.normal(k[0], (2, 6, 8, 8, 8), f32)
    w = 0.3 * jax.random.normal(k[1], (12, 6, 3, 3, 3), f32)
    b = 0.1 * jax.random.normal(k[2], (12,), f32)
    a = 0.25 * jnp.ones((12,), f32)
    xcm, sp = _to_cm(x)
    got = _from_cm(conv3x3_pallas([xcm], [w], b, a, sp, out_dtype=f32), sp)
    assert jnp.max(jnp.abs(got - _ref_conv3x3(x, w, b, a))) < 5e-2

    # enc1-style conv + broadcast residual (cin=1 -> cout=2)
    x1 = jax.random.normal(k[3], (2, 1, 8, 8, 8), f32)
    w1 = 0.3 * jax.random.normal(k[4], (2, 1, 3, 3, 3), f32)
    b1 = 0.1 * jax.random.normal(k[5], (2,), f32)
    a1 = 0.25 * jnp.ones((2,), f32)
    x1cm, s1 = _to_cm(x1)
    got = _from_cm(conv3x3_pallas([x1cm], [w1], b1, a1, s1, out_dtype=f32,
                                  residual_from=0), s1)
    assert jnp.max(jnp.abs(got - _ref_conv3x3(x1, w1, b1, a1, residual=True))) < 5e-2

    # fused concat conv (two inputs, like the decoder stages)
    xa = jax.random.normal(k[6], (2, 4, 8, 8, 8), f32)
    xb = jax.random.normal(k[7], (2, 2, 8, 8, 8), f32)
    xacm, spa = _to_cm(xa)
    xbcm, _ = _to_cm(xb)
    got = _from_cm(conv3x3_pallas([xacm, xbcm], [w[:, :4], w[:, 4:]], b, a, spa,
                                  out_dtype=f32), spa)
    ref = _ref_conv3x3(jnp.concatenate([xa, xb], axis=1), w, b, a)
    assert jnp.max(jnp.abs(got - ref)) < 5e-2

    # 2x2x2 stride-2 conv + PReLU
    wd = 0.3 * jax.random.normal(k[1], (4, 6, 2, 2, 2), f32)
    bd = 0.1 * jax.random.normal(k[2], (4,), f32)
    ad = 0.25 * jnp.ones((4,), f32)
    got, spd = conv3d_k2s2(xcm, {"w": wd, "b": bd, "alpha": ad}, sp, f32)
    assert jnp.max(jnp.abs(_from_cm(got, spd) - _ref_conv_k2s2(x, wd, bd, ad))) < 5e-2

    # transposed 2x2x2 stride-2 conv + PReLU
    wt = 0.3 * jax.random.normal(k[4], (6, 4, 2, 2, 2), f32)
    got, spt = convtrans3d_k2s2(xcm, {"w": wt, "b": bd, "alpha": ad}, sp, f32)
    assert jnp.max(jnp.abs(_from_cm(got, spt)
                           - _ref_convtrans_k2s2(x, wt, bd, ad))) < 5e-2


# ------------------------------------ main ------------------------------------

if __name__ == "__main__":
    _self_test()

    key = jax.random.PRNGKey(0)
    pkey, xkey, dkey = jax.random.split(key, 3)

    params = init_params(pkey, in_channel=1, out_channel=2)
    x = jax.random.normal(xkey, (2, 1, 16, 16, 16), jnp.float32)   # NCDHW

    fwd = jax.jit(lambda p, xx, dk: resunet_forward(p, xx, dk, training=True))
    outs = jax.block_until_ready(fwd(params, x, dkey))

    # sanity: 4 heads, right shapes, channel softmax sums to 1
    assert len(outs) == 4
    for o in outs:
        assert o.shape == (2, 2, 16, 16, 16)
        assert bool(jnp.all(jnp.isfinite(o)))
        ch_sum = jnp.sum(o, axis=1)
        assert bool(jnp.allclose(ch_sum, 1.0, atol=1e-3))

    print("KERNEL_OK")
</pallas_src>

<mosaic_0001>
module attributes {stable_mosaic.version = 11 : i64} {
  func.func @kernel(%arg0: i32, %arg1: memref<1x8x768xf32, #tpu.memory_space<vmem>>, %arg2: memref<27x12x8xf32, #tpu.memory_space<vmem>>, %arg3: memref<12x1xf32, #tpu.memory_space<vmem>>, %arg4: memref<12x1xf32, #tpu.memory_space<vmem>>, %arg5: memref<12x512xf32, #tpu.memory_space<vmem>>) attributes {dimension_semantics = [#tpu.dimension_semantics<parallel>], iteration_bounds = array<i64: 4>, scalar_prefetch = 0 : i64, scratch_operands = 0 : i64, tpu.core_type = #tpu.core_type<tc>, window_params = [{transform_indices = @transform_0, window_bounds = array<i64: 1, 8, 768>}, {pipeline_mode = #tpu.pipeline_mode<synchronous>, transform_indices = @transform_1, window_bounds = array<i64: 27, 12, 8>}, {pipeline_mode = #tpu.pipeline_mode<synchronous>, transform_indices = @transform_2, window_bounds = array<i64: 12, 1>}, {pipeline_mode = #tpu.pipeline_mode<synchronous>, transform_indices = @transform_3, window_bounds = array<i64: 12, 1>}, {transform_indices = @transform_4, window_bounds = array<i64: 12, 512>}]} {
    %cst = arith.constant 0.000000e+00 : f32
    %0 = vector.broadcast %cst : f32 to vector<12x512xf32>
    %c0 = arith.constant 0 : index
    %c0_0 = arith.constant 0 : index
    %c0_1 = arith.constant 0 : index
    %1 = vector.load %arg2[%c0, %c0_0, %c0_1] : memref<27x12x8xf32, #tpu.memory_space<vmem>>, vector<1x12x8xf32>
    %2 = vector.shape_cast %1 : vector<1x12x8xf32> to vector<12x8xf32>
    %c0_2 = arith.constant 0 : index
    %c0_3 = arith.constant 0 : index
    %c17 = arith.constant 17 : index
    %3 = vector.load %arg1[%c0_2, %c0_3, %c17] : memref<1x8x768xf32, #tpu.memory_space<vmem>>, vector<1x8x512xf32>
    %4 = vector.shape_cast %3 : vector<1x8x512xf32> to vector<8x512xf32>
    %cst_4 = arith.constant dense<0.000000e+00> : vector<12x512xf32>
    %5 = tpu.matmul %2, %4, %cst_4 {dimension_numbers = #tpu.dot_dimension_numbers<[1], [0], [0], [1], [0, 0, 1, 1], [], []>} : vector<12x8xf32>, vector<8x512xf32>, vector<12x512xf32> -> vector<12x512xf32>
    %6 = arith.addf %0, %5 : vector<12x512xf32>
    %c1 = arith.constant 1 : index
    %c0_5 = arith.constant 0 : index
    %c0_6 = arith.constant 0 : index
    %7 = vector.load %arg2[%c1, %c0_5, %c0_6] : memref<27x12x8xf32, #tpu.memory_space<vmem>>, vector<1x12x8xf32>
    %8 = vector.shape_cast %7 : vector<1x12x8xf32> to vector<12x8xf32>
    %c0_7 = arith.constant 0 : index
    %c0_8 = arith.constant 0 : index
    %c18 = arith.constant 18 : index
    %9 = vector.load %arg1[%c0_7, %c0_8, %c18] : memref<1x8x768xf32, #tpu.memory_space<vmem>>, vector<1x8x512xf32>
    %10 = vector.shape_cast %9 : vector<1x8x512xf32> to vector<8x512xf32>
    %cst_9 = arith.constant dense<0.000000e+00> : vector<12x512xf32>
    %11 = tpu.matmul %8, %10, %cst_9 {dimension_numbers = #tpu.dot_dimension_numbers<[1], [0], [0], [1], [0, 0, 1, 1], [], []>} : vector<12x8xf32>, vector<8x512xf32>, vector<12x512xf32> -> vector<12x512xf32>
    %12 = arith.addf %6, %11 : vector<12x512xf32>
    %c2 = arith.constant 2 : index
    %c0_10 = arith.constant 0 : index
    %c0_11 = arith.constant 0 : index
    %13 = vector.load %arg2[%c2, %c0_10, %c0_11] : memref<27x12x8xf32, #tpu.memory_space<vmem>>, vector<1x12x8xf32>
    %14 = vector.shape_cast %13 : vector<1x12x8xf32> to vector<12x8xf32>
    %c0_12 = arith.constant 0 : index
    %c0_13 = arith.constant 0 : index
    %c19 = arith.constant 19 : index
    %15 = vector.load %arg1[%c0_12, %c0_13, %c19] : memref<1x8x768xf32, #tpu.memory_space<vmem>>, vector<1x8x512xf32>
    %16 = vector.shape_cast %15 : vector<1x8x512xf32> to vector<8x512xf32>
    %cst_14 = arith.constant dense<0.000000e+00> : vector<12x512xf32>
    %17 = tpu.matmul %14, %16, %cst_14 {dimension_numbers = #tpu.dot_dimension_numbers<[1], [0], [0], [1], [0, 0, 1, 1], [], []>} : vector<12x8xf32>, vector<8x512xf32>, vector<12x512xf32> -> vector<12x512xf32>
    %18 = arith.addf %12, %17 : vector<12x512xf32>
    %c3 = arith.constant 3 : index
    %c0_15 = arith.constant 0 : index
    %c0_16 = arith.constant 0 : index
    %19 = vector.load %arg2[%c3, %c0_15, %c0_16] : memref<27x12x8xf32, #tpu.memory_space<vmem>>, vector<1x12x8xf32>
    %20 = vector.shape_cast %19 : vector<1x12x8xf32> to vector<12x8xf32>
    %c0_17 = arith.constant 0 : index
    %c0_18 = arith.constant 0 : index
    %c27 = arith.constant 27 : index
    %21 = vector.load %arg1[%c0_17, %c0_18, %c27] : memref<1x8x768xf32, #tpu.memory_space<vmem>>, vector<1x8x512xf32>
    %22 = vector.shape_cast %21 : vector<1x8x512xf32> to vector<8x512xf32>
    %cst_19 = arith.constant dense<0.000000e+00> : vector<12x512xf32>
    %23 = tpu.matmul %20, %22, %cst_19 {dimension_numbers = #tpu.dot_dimension_numbers<[1], [0], [0], [1], [0, 0, 1, 1], [], []>} : vector<12x8xf32>, vector<8x512xf32>, vector<12x512xf32> -> vector<12x512xf32>
    %24 = arith.addf %18, %23 : vector<12x512xf32>
    %c4 = arith.constant 4 : index
    %c0_20 = arith.constant 0 : index
    %c0_21 = arith.constant 0 : index
    %25 = vector.load %arg2[%c4, %c0_20, %c0_21] : memref<27x12x8xf32, #tpu.memory_space<vmem>>, vector<1x12x8xf32>
    %26 = vector.shape_cast %25 : vector<1x12x8xf32> to vector<12x8xf32>
    %c0_22 = arith.constant 0 : index
    %c0_23 = arith.constant 0 : index
    %c28 = arith.constant 28 : index
    %27 = vector.load %arg1[%c0_22, %c0_23, %c28] : memref<1x8x768xf32, #tpu.memory_space<vmem>>, vector<1x8x512xf32>
    %28 = vector.shape_cast %27 : vector<1x8x512xf32> to vector<8x512xf32>
    %cst_24 = arith.constant dense<0.000000e+00> : vector<12x512xf32>
    %29 = tpu.matmul %26, %28, %cst_24 {dimension_numbers = #tpu.dot_dimension_numbers<[1], [0], [0], [1], [0, 0, 1, 1], [], []>} : vector<12x8xf32>, vector<8x512xf32>, vector<12x512xf32> -> vector<12x512xf32>
    %30 = arith.addf %24, %29 : vector<12x512xf32>
    %c5 = arith.constant 5 : index
    %c0_25 = arith.constant 0 : index
    %c0_26 = arith.constant 0 : index
    %31 = vector.load %arg2[%c5, %c0_25, %c0_26] : memref<27x12x8xf32, #tpu.memory_space<vmem>>, vector<1x12x8xf32>
    %32 = vector.shape_cast %31 : vector<1x12x8xf32> to vector<12x8xf32>
    %c0_27 = arith.constant 0 : index
    %c0_28 = arith.constant 0 : index
    %c29 = arith.constant 29 : index
    %33 = vector.load %arg1[%c0_27, %c0_28, %c29] : memref<1x8x768xf32, #tpu.memory_space<vmem>>, vector<1x8x512xf32>
    %34 = vector.shape_cast %33 : vector<1x8x512xf32> to vector<8x512xf32>
    %cst_29 = arith.constant dense<0.000000e+00> : vector<12x512xf32>
    %35 = tpu.matmul %32, %34, %cst_29 {dimension_numbers = #tpu.dot_dimension_numbers<[1], [0], [0], [1], [0, 0, 1, 1], [], []>} : vector<12x8xf32>, vector<8x512xf32>, vector<12x512xf32> -> vector<12x512xf32>
    %36 = arith.addf %30, %35 : vector<12x512xf32>
    %c6 = arith.constant 6 : index
    %c0_30 = arith.constant 0 : index
    %c0_31 = arith.constant 0 : index
    %37 = vector.load %arg2[%c6, %c0_30, %c0_31] : memref<27x12x8xf32, #tpu.memory_space<vmem>>, vector<1x12x8xf32>
    %38 = vector.shape_cast %37 : vector<1x12x8xf32> to vector<12x8xf32>
    %c0_32 = arith.constant 0 : index
    %c0_33 = arith.constant 0 : index
    %c37 = arith.constant 37 : index
    %39 = vector.load %arg1[%c0_32, %c0_33, %c37] : memref<1x8x768xf32, #tpu.memory_space<vmem>>, vector<1x8x512xf32>
    %40 = vector.shape_cast %39 : vector<1x8x512xf32> to vector<8x512xf32>
    %cst_34 = arith.constant dense<0.000000e+00> : vector<12x512xf32>
    %41 = tpu.matmul %38, %40, %cst_34 {dimension_numbers = #tpu.dot_dimension_numbers<[1], [0], [0], [1], [0, 0, 1, 1], [], []>} : vector<12x8xf32>, vector<8x512xf32>, vector<12x512xf32> -> vector<12x512xf32>
    %42 = arith.addf %36, %41 : vector<12x512xf32>
    %c7 = arith.constant 7 : index
    %c0_35 = arith.constant 0 : index
    %c0_36 = arith.constant 0 : index
    %43 = vector.load %arg2[%c7, %c0_35, %c0_36] : memref<27x12x8xf32, #tpu.memory_space<vmem>>, vector<1x12x8xf32>
    %44 = vector.shape_cast %43 : vector<1x12x8xf32> to vector<12x8xf32>
    %c0_37 = arith.constant 0 : index
    %c0_38 = arith.constant 0 : index
    %c38 = arith.constant 38 : index
    %45 = vector.load %arg1[%c0_37, %c0_38, %c38] : memref<1x8x768xf32, #tpu.memory_space<vmem>>, vector<1x8x512xf32>
    %46 = vector.shape_cast %45 : vector<1x8x512xf32> to vector<8x512xf32>
    %cst_39 = arith.constant dense<0.000000e+00> : vector<12x512xf32>
    %47 = tpu.matmul %44, %46, %cst_39 {dimension_numbers = #tpu.dot_dimension_numbers<[1], [0], [0], [1], [0, 0, 1, 1], [], []>} : vector<12x8xf32>, vector<8x512xf32>, vector<12x512xf32> -> vector<12x512xf32>
    %48 = arith.addf %42, %47 : vector<12x512xf32>
    %c8 = arith.constant 8 : index
    %c0_40 = arith.constant 0 : index
    %c0_41 = arith.constant 0 : index
    %49 = vector.load %arg2[%c8, %c0_40, %c0_41] : memref<27x12x8xf32, #tpu.memory_space<vmem>>, vector<1x12x8xf32>
    %50 = vector.shape_cast %49 : vector<1x12x8xf32> to vector<12x8xf32>
    %c0_42 = arith.constant 0 : index
    %c0_43 = arith.constant 0 : index
    %c39 = arith.constant 39 : index
    %51 = vector.load %arg1[%c0_42, %c0_43, %c39] : memref<1x8x768xf32, #tpu.memory_space<vmem>>, vector<1x8x512xf32>
    %52 = vector.shape_cast %51 : vector<1x8x512xf32> to vector<8x512xf32>
    %cst_44 = arith.constant dense<0.000000e+00> : vector<12x512xf32>
    %53 = tpu.matmul %50, %52, %cst_44 {dimension_numbers = #tpu.dot_dimension_numbers<[1], [0], [0], [1], [0, 0, 1, 1], [], []>} : vector<12x8xf32>, vector<8x512xf32>, vector<12x512xf32> -> vector<12x512xf32>
    %54 = arith.addf %48, %53 : vector<12x512xf32>
    %c9 = arith.constant 9 : index
    %c0_45 = arith.constant 0 : index
    %c0_46 = arith.constant 0 : index
    %55 = vector.load %arg2[%c9, %c0_45, %c0_46] : memref<27x12x8xf32, #tpu.memory_space<vmem>>, vector<1x12x8xf32>
    %56 = vector.shape_cast %55 : vector<1x12x8xf32> to vector<12x8xf32>
    %c0_47 = arith.constant 0 : index
    %c0_48 = arith.constant 0 : index
    %c117 = arith.constant 117 : index
    %57 = vector.load %arg1[%c0_47, %c0_48, %c117] : memref<1x8x768xf32, #tpu.memory_space<vmem>>, vector<1x8x512xf32>
    %58 = vector.shape_cast %57 : vector<1x8x512xf32> to vector<8x512xf32>
    %cst_49 = arith.constant dense<0.000000e+00> : vector<12x512xf32>
    %59 = tpu.matmul %56, %58, %cst_49 {dimension_numbers = #tpu.dot_dimension_numbers<[1], [0], [0], [1], [0, 0, 1, 1], [], []>} : vector<12x8xf32>, vector<8x512xf32>, vector<12x512xf32> -> vector<12x512xf32>
    %60 = arith.addf %54, %59 : vector<12x512xf32>
    %c10 = arith.constant 10 : index
    %c0_50 = arith.constant 0 : index
    %c0_51 = arith.constant 0 : index
    %61 = vector.load %arg2[%c10, %c0_50, %c0_51] : memref<27x12x8xf32, #tpu.memory_space<vmem>>, vector<1x12x8xf32>
    %62 = vector.shape_cast %61 : vector<1x12x8xf32> to vector<12x8xf32>
    %c0_52 = arith.constant 0 : index
    %c0_53 = arith.constant 0 : index
    %c118 = arith.constant 118 : index
    %63 = vector.load %arg1[%c0_52, %c0_53, %c118] : memref<1x8x768xf32, #tpu.memory_space<vmem>>, vector<1x8x512xf32>
    %64 = vector.shape_cast %63 : vector<1x8x512xf32> to vector<8x512xf32>
    %cst_54 = arith.constant dense<0.000000e+00> : vector<12x512xf32>
    %65 = tpu.matmul %62, %64, %cst_54 {dimension_numbers = #tpu.dot_dimension_numbers<[1], [0], [0], [1], [0, 0, 1, 1], [], []>} : vector<12x8xf32>, vector<8x512xf32>, vector<12x512xf32> -> vector<12x512xf32>
    %66 = arith.addf %60, %65 : vector<12x512xf32>
    %c11 = arith.constant 11 : index
    %c0_55 = arith.constant 0 : index
    %c0_56 = arith.constant 0 : index
    %67 = vector.load %arg2[%c11, %c0_55, %c0_56] : memref<27x12x8xf32, #tpu.memory_space<vmem>>, vector<1x12x8xf32>
    %68 = vector.shape_cast %67 : vector<1x12x8xf32> to vector<12x8xf32>
    %c0_57 = arith.constant 0 : index
    %c0_58 = arith.constant 0 : index
    %c119 = arith.constant 119 : index
    %69 = vector.load %arg1[%c0_57, %c0_58, %c119] : memref<1x8x768xf32, #tpu.memory_space<vmem>>, vector<1x8x512xf32>
    %70 = vector.shape_cast %69 : vector<1x8x512xf32> to vector<8x512xf32>
    %cst_59 = arith.constant dense<0.000000e+00> : vector<12x512xf32>
    %71 = tpu.matmul %68, %70, %cst_59 {dimension_numbers = #tpu.dot_dimension_numbers<[1], [0], [0], [1], [0, 0, 1, 1], [], []>} : vector<12x8xf32>, vector<8x512xf32>, vector<12x512xf32> -> vector<12x512xf32>
    %72 = arith.addf %66, %71 : vector<12x512xf32>
    %c12 = arith.constant 12 : index
    %c0_60 = arith.constant 0 : index
    %c0_61 = arith.constant 0 : index
    %73 = vector.load %arg2[%c12, %c0_60, %c0_61] : memref<27x12x8xf32, #tpu.memory_space<vmem>>, vector<1x12x8xf32>
    %74 = vector.shape_cast %73 : vector<1x12x8xf32> to vector<12x8xf32>
    %c0_62 = arith.constant 0 : index
    %c0_63 = arith.constant 0 : index
    %c127 = arith.constant 127 : index
    %75 = vector.load %arg1[%c0_62, %c0_63, %c127] : memref<1x8x768xf32, #tpu.memory_space<vmem>>, vector<1x8x512xf32>
    %76 = vector.shape_cast %75 : vector<1x8x512xf32> to vector<8x512xf32>
    %cst_64 = arith.constant dense<0.000000e+00> : vector<12x512xf32>
    %77 = tpu.matmul %74, %76, %cst_64 {dimension_numbers = #tpu.dot_dimension_numbers<[1], [0], [0], [1], [0, 0, 1, 1], [], []>} : vector<12x8xf32>, vector<8x512xf32>, vector<12x512xf32> -> vector<12x512xf32>
    %78 = arith.addf %72, %77 : vector<12x512xf32>
    %c13 = arith.constant 13 : index
    %c0_65 = arith.constant 0 : index
    %c0_66 = arith.constant 0 : index
    %79 = vector.load %arg2[%c13, %c0_65, %c0_66] : memref<27x12x8xf32, #tpu.memory_space<vmem>>, vector<1x12x8xf32>
    %80 = vector.shape_cast %79 : vector<1x12x8xf32> to vector<12x8xf32>
    %c0_67 = arith.constant 0 : index
    %c0_68 = arith.constant 0 : index
    %c128 = arith.constant 128 : index
    %81 = vector.load %arg1[%c0_67, %c0_68, %c128] : memref<1x8x768xf32, #tpu.memory_space<vmem>>, vector<1x8x512xf32>
    %82 = vector.shape_cast %81 : vector<1x8x512xf32> to vector<8x512xf32>
    %cst_69 = arith.constant dense<0.000000e+00> : vector<12x512xf32>
    %83 = tpu.matmul %80, %82, %cst_69 {dimension_numbers = #tpu.dot_dimension_numbers<[1], [0], [0], [1], [0, 0, 1, 1], [], []>} : vector<12x8xf32>, vector<8x512xf32>, vector<12x512xf32> -> vector<12x512xf32>
    %84 = arith.addf %78, %83 : vector<12x512xf32>
    %c14 = arith.constant 14 : index
    %c0_70 = arith.constant 0 : index
    %c0_71 = arith.constant 0 : index
    %85 = vector.load %arg2[%c14, %c0_70, %c0_71] : memref<27x12x8xf32, #tpu.memory_space<vmem>>, vector<1x12x8xf32>
    %86 = vector.shape_cast %85 : vector<1x12x8xf32> to vector<12x8xf32>
    %c0_72 = arith.constant 0 : index
    %c0_73 = arith.constant 0 : index
    %c129 = arith.constant 129 : index
    %87 = vector.load %arg1[%c0_72, %c0_73, %c129] : memref<1x8x768xf32, #tpu.memory_space<vmem>>, vector<1x8x512xf32>
    %88 = vector.shape_cast %87 : vector<1x8x512xf32> to vector<8x512xf32>
    %cst_74 = arith.constant dense<0.000000e+00> : vector<12x512xf32>
    %89 = tpu.matmul %86, %88, %cst_74 {dimension_numbers = #tpu.dot_dimension_numbers<[1], [0], [0], [1], [0, 0, 1, 1], [], []>} : vector<12x8xf32>, vector<8x512xf32>, vector<12x512xf32> -> vector<12x512xf32>
    %90 = arith.addf %84, %89 : vector<12x512xf32>
    %c15 = arith.constant 15 : index
    %c0_75 = arith.constant 0 : index
    %c0_76 = arith.constant 0 : index
    %91 = vector.load %arg2[%c15, %c0_75, %c0_76] : memref<27x12x8xf32, #tpu.memory_space<vmem>>, vector<1x12x8xf32>
    %92 = vector.shape_cast %91 : vector<1x12x8xf32> to vector<12x8xf32>
    %c0_77 = arith.constant 0 : index
    %c0_78 = arith.constant 0 : index
    %c137 = arith.constant 137 : index
    %93 = vector.load %arg1[%c0_77, %c0_78, %c137] : memref<1x8x768xf32, #tpu.memory_space<vmem>>, vector<1x8x512xf32>
    %94 = vector.shape_cast %93 : vector<1x8x512xf32> to vector<8x512xf32>
    %cst_79 = arith.constant dense<0.000000e+00> : vector<12x512xf32>
    %95 = tpu.matmul %92, %94, %cst_79 {dimension_numbers = #tpu.dot_dimension_numbers<[1], [0], [0], [1], [0, 0, 1, 1], [], []>} : vector<12x8xf32>, vector<8x512xf32>, vector<12x512xf32> -> vector<12x512xf32>
    %96 = arith.addf %90, %95 : vector<12x512xf32>
    %c16 = arith.constant 16 : index
    %c0_80 = arith.constant 0 : index
    %c0_81 = arith.constant 0 : index
    %97 = vector.load %arg2[%c16, %c0_80, %c0_81] : memref<27x12x8xf32, #tpu.memory_space<vmem>>, vector<1x12x8xf32>
    %98 = vector.shape_cast %97 : vector<1x12x8xf32> to vector<12x8xf32>
    %c0_82 = arith.constant 0 : index
    %c0_83 = arith.constant 0 : index
    %c138 = arith.constant 138 : index
    %99 = vector.load %arg1[%c0_82, %c0_83, %c138] : memref<1x8x768xf32, #tpu.memory_space<vmem>>, vector<1x8x512xf32>
    %100 = vector.shape_cast %99 : vector<1x8x512xf32> to vector<8x512xf32>
    %cst_84 = arith.constant dense<0.000000e+00> : vector<12x512xf32>
    %101 = tpu.matmul %98, %100, %cst_84 {dimension_numbers = #tpu.dot_dimension_numbers<[1], [0], [0], [1], [0, 0, 1, 1], [], []>} : vector<12x8xf32>, vector<8x512xf32>, vector<12x512xf32> -> vector<12x512xf32>
    %102 = arith.addf %96, %101 : vector<12x512xf32>
    %c17_85 = arith.constant 17 : index
    %c0_86 = arith.constant 0 : index
    %c0_87 = arith.constant 0 : index
    %103 = vector.load %arg2[%c17_85, %c0_86, %c0_87] : memref<27x12x8xf32, #tpu.memory_space<vmem>>, vector<1x12x8xf32>
    %104 = vector.shape_cast %103 : vector<1x12x8xf32> to vector<12x8xf32>
    %c0_88 = arith.constant 0 : index
    %c0_89 = arith.constant 0 : index
    %c139 = arith.constant 139 : index
    %105 = vector.load %arg1[%c0_88, %c0_89, %c139] : memref<1x8x768xf32, #tpu.memory_space<vmem>>, vector<1x8x512xf32>
    %106 = vector.shape_cast %105 : vector<1x8x512xf32> to vector<8x512xf32>
    %cst_90 = arith.constant dense<0.000000e+00> : vector<12x512xf32>
    %107 = tpu.matmul %104, %106, %cst_90 {dimension_numbers = #tpu.dot_dimension_numbers<[1], [0], [0], [1], [0, 0, 1, 1], [], []>} : vector<12x8xf32>, vector<8x512xf32>, vector<12x512xf32> -> vector<12x512xf32>
    %108 = arith.addf %102, %107 : vector<12x512xf32>
    %c18_91 = arith.constant 18 : index
    %c0_92 = arith.constant 0 : index
    %c0_93 = arith.constant 0 : index
    %109 = vector.load %arg2[%c18_91, %c0_92, %c0_93] : memref<27x12x8xf32, #tpu.memory_space<vmem>>, vector<1x12x8xf32>
    %110 = vector.shape_cast %109 : vector<1x12x8xf32> to vector<12x8xf32>
    %c0_94 = arith.constant 0 : index
    %c0_95 = arith.constant 0 : index
    %c217 = arith.constant 217 : index
    %111 = vector.load %arg1[%c0_94, %c0_95, %c217] : memref<1x8x768xf32, #tpu.memory_space<vmem>>, vector<1x8x512xf32>
    %112 = vector.shape_cast %111 : vector<1x8x512xf32> to vector<8x512xf32>
    %cst_96 = arith.constant dense<0.000000e+00> : vector<12x512xf32>
    %113 = tpu.matmul %110, %112, %cst_96 {dimension_numbers = #tpu.dot_dimension_numbers<[1], [0], [0], [1], [0, 0, 1, 1], [], []>} : vector<12x8xf32>, vector<8x512xf32>, vector<12x512xf32> -> vector<12x512xf32>
    %114 = arith.addf %108, %113 : vector<12x512xf32>
    %c19_97 = arith.constant 19 : index
    %c0_98 = arith.constant 0 : index
    %c0_99 = arith.constant 0 : index
    %115 = vector.load %arg2[%c19_97, %c0_98, %c0_99] : memref<27x12x8xf32, #tpu.memory_space<vmem>>, vector<1x12x8xf32>
    %116 = vector.shape_cast %115 : vector<1x12x8xf32> to vector<12x8xf32>
    %c0_100 = arith.constant 0 : index
    %c0_101 = arith.constant 0 : index
    %c218 = arith.constant 218 : index
    %117 = vector.load %arg1[%c0_100, %c0_101, %c218] : memref<1x8x768xf32, #tpu.memory_space<vmem>>, vector<1x8x512xf32>
    %118 = vector.shape_cast %117 : vector<1x8x512xf32> to vector<8x512xf32>
    %cst_102 = arith.constant dense<0.000000e+00> : vector<12x512xf32>
    %119 = tpu.matmul %116, %118, %cst_102 {dimension_numbers = #tpu.dot_dimension_numbers<[1], [0], [0], [1], [0, 0, 1, 1], [], []>} : vector<12x8xf32>, vector<8x512xf32>, vector<12x512xf32> -> vector<12x512xf32>
    %120 = arith.addf %114, %119 : vector<12x512xf32>
    %c20 = arith.constant 20 : index
    %c0_103 = arith.constant 0 : index
    %c0_104 = arith.constant 0 : index
    %121 = vector.load %arg2[%c20, %c0_103, %c0_104] : memref<27x12x8xf32, #tpu.memory_space<vmem>>, vector<1x12x8xf32>
    %122 = vector.shape_cast %121 : vector<1x12x8xf32> to vector<12x8xf32>
    %c0_105 = arith.constant 0 : index
    %c0_106 = arith.constant 0 : index
    %c219 = arith.constant 219 : index
    %123 = vector.load %arg1[%c0_105, %c0_106, %c219] : memref<1x8x768xf32, #tpu.memory_space<vmem>>, vector<1x8x512xf32>
    %124 = vector.shape_cast %123 : vector<1x8x512xf32> to vector<8x512xf32>
    %cst_107 = arith.constant dense<0.000000e+00> : vector<12x512xf32>
    %125 = tpu.matmul %122, %124, %cst_107 {dimension_numbers = #tpu.dot_dimension_numbers<[1], [0], [0], [1], [0, 0, 1, 1], [], []>} : vector<12x8xf32>, vector<8x512xf32>, vector<12x512xf32> -> vector<12x512xf32>
    %126 = arith.addf %120, %125 : vector<12x512xf32>
    %c21 = arith.constant 21 : index
    %c0_108 = arith.constant 0 : index
    %c0_109 = arith.constant 0 : index
    %127 = vector.load %arg2[%c21, %c0_108, %c0_109] : memref<27x12x8xf32, #tpu.memory_space<vmem>>, vector<1x12x8xf32>
    %128 = vector.shape_cast %127 : vector<1x12x8xf32> to vector<12x8xf32>
    %c0_110 = arith.constant 0 : index
    %c0_111 = arith.constant 0 : index
    %c227 = arith.constant 227 : index
    %129 = vector.load %arg1[%c0_110, %c0_111, %c227] : memref<1x8x768xf32, #tpu.memory_space<vmem>>, vector<1x8x512xf32>
    %130 = vector.shape_cast %129 : vector<1x8x512xf32> to vector<8x512xf32>
    %cst_112 = arith.constant dense<0.000000e+00> : vector<12x512xf32>
    %131 = tpu.matmul %128, %130, %cst_112 {dimension_numbers = #tpu.dot_dimension_numbers<[1], [0], [0], [1], [0, 0, 1, 1], [], []>} : vector<12x8xf32>, vector<8x512xf32>, vector<12x512xf32> -> vector<12x512xf32>
    %132 = arith.addf %126, %131 : vector<12x512xf32>
    %c22 = arith.constant 22 : index
    %c0_113 = arith.constant 0 : index
    %c0_114 = arith.constant 0 : index
    %133 = vector.load %arg2[%c22, %c0_113, %c0_114] : memref<27x12x8xf32, #tpu.memory_space<vmem>>, vector<1x12x8xf32>
    %134 = vector.shape_cast %133 : vector<1x12x8xf32> to vector<12x8xf32>
    %c0_115 = arith.constant 0 : index
    %c0_116 = arith.constant 0 : index
    %c228 = arith.constant 228 : index
    %135 = vector.load %arg1[%c0_115, %c0_116, %c228] : memref<1x8x768xf32, #tpu.memory_space<vmem>>, vector<1x8x512xf32>
    %136 = vector.shape_cast %135 : vector<1x8x512xf32> to vector<8x512xf32>
    %cst_117 = arith.constant dense<0.000000e+00> : vector<12x512xf32>
    %137 = tpu.matmul %134, %136, %cst_117 {dimension_numbers = #tpu.dot_dimension_numbers<[1], [0], [0], [1], [0, 0, 1, 1], [], []>} : vector<12x8xf32>, vector<8x512xf32>, vector<12x512xf32> -> vector<12x512xf32>
    %138 = arith.addf %132, %137 : vector<12x512xf32>
    %c23 = arith.constant 23 : index
    %c0_118 = arith.constant 0 : index
    %c0_119 = arith.constant 0 : index
    %139 = vector.load %arg2[%c23, %c0_118, %c0_119] : memref<27x12x8xf32, #tpu.memory_space<vmem>>, vector<1x12x8xf32>
    %140 = vector.shape_cast %139 : vector<1x12x8xf32> to vector<12x8xf32>
    %c0_120 = arith.constant 0 : index
    %c0_121 = arith.constant 0 : index
    %c229 = arith.constant 229 : index
    %141 = vector.load %arg1[%c0_120, %c0_121, %c229] : memref<1x8x768xf32, #tpu.memory_space<vmem>>, vector<1x8x512xf32>
    %142 = vector.shape_cast %141 : vector<1x8x512xf32> to vector<8x512xf32>
    %cst_122 = arith.constant dense<0.000000e+00> : vector<12x512xf32>
    %143 = tpu.matmul %140, %142, %cst_122 {dimension_numbers = #tpu.dot_dimension_numbers<[1], [0], [0], [1], [0, 0, 1, 1], [], []>} : vector<12x8xf32>, vector<8x512xf32>, vector<12x512xf32> -> vector<12x512xf32>
    %144 = arith.addf %138, %143 : vector<12x512xf32>
    %c24 = arith.constant 24 : index
    %c0_123 = arith.constant 0 : index
    %c0_124 = arith.constant 0 : index
    %145 = vector.load %arg2[%c24, %c0_123, %c0_124] : memref<27x12x8xf32, #tpu.memory_space<vmem>>, vector<1x12x8xf32>
    %146 = vector.shape_cast %145 : vector<1x12x8xf32> to vector<12x8xf32>
    %c0_125 = arith.constant 0 : index
    %c0_126 = arith.constant 0 : index
    %c237 = arith.constant 237 : index
    %147 = vector.load %arg1[%c0_125, %c0_126, %c237] : memref<1x8x768xf32, #tpu.memory_space<vmem>>, vector<1x8x512xf32>
    %148 = vector.shape_cast %147 : vector<1x8x512xf32> to vector<8x512xf32>
    %cst_127 = arith.constant dense<0.000000e+00> : vector<12x512xf32>
    %149 = tpu.matmul %146, %148, %cst_127 {dimension_numbers = #tpu.dot_dimension_numbers<[1], [0], [0], [1], [0, 0, 1, 1], [], []>} : vector<12x8xf32>, vector<8x512xf32>, vector<12x512xf32> -> vector<12x512xf32>
    %150 = arith.addf %144, %149 : vector<12x512xf32>
    %c25 = arith.constant 25 : index
    %c0_128 = arith.constant 0 : index
    %c0_129 = arith.constant 0 : index
    %151 = vector.load %arg2[%c25, %c0_128, %c0_129] : memref<27x12x8xf32, #tpu.memory_space<vmem>>, vector<1x12x8xf32>
    %152 = vector.shape_cast %151 : vector<1x12x8xf32> to vector<12x8xf32>
    %c0_130 = arith.constant 0 : index
    %c0_131 = arith.constant 0 : index
    %c238 = arith.constant 238 : index
    %153 = vector.load %arg1[%c0_130, %c0_131, %c238] : memref<1x8x768xf32, #tpu.memory_space<vmem>>, vector<1x8x512xf32>
    %154 = vector.shape_cast %153 : vector<1x8x512xf32> to vector<8x512xf32>
    %cst_132 = arith.constant dense<0.000000e+00> : vector<12x512xf32>
    %155 = tpu.matmul %152, %154, %cst_132 {dimension_numbers = #tpu.dot_dimension_numbers<[1], [0], [0], [1], [0, 0, 1, 1], [], []>} : vector<12x8xf32>, vector<8x512xf32>, vector<12x512xf32> -> vector<12x512xf32>
    %156 = arith.addf %150, %155 : vector<12x512xf32>
    %c26 = arith.constant 26 : index
    %c0_133 = arith.constant 0 : index
    %c0_134 = arith.constant 0 : index
    %157 = vector.load %arg2[%c26, %c0_133, %c0_134] : memref<27x12x8xf32, #tpu.memory_space<vmem>>, vector<1x12x8xf32>
    %158 = vector.shape_cast %157 : vector<1x12x8xf32> to vector<12x8xf32>
    %c0_135 = arith.constant 0 : index
    %c0_136 = arith.constant 0 : index
    %c239 = arith.constant 239 : index
    %159 = vector.load %arg1[%c0_135, %c0_136, %c239] : memref<1x8x768xf32, #tpu.memory_space<vmem>>, vector<1x8x512xf32>
    %160 = vector.shape_cast %159 : vector<1x8x512xf32> to vector<8x512xf32>
    %cst_137 = arith.constant dense<0.000000e+00> : vector<12x512xf32>
    %161 = tpu.matmul %158, %160, %cst_137 {dimension_numbers = #tpu.dot_dimension_numbers<[1], [0], [0], [1], [0, 0, 1, 1], [], []>} : vector<12x8xf32>, vector<8x512xf32>, vector<12x512xf32> -> vector<12x512xf32>
    %162 = arith.addf %156, %161 : vector<12x512xf32>
    %c0_138 = arith.constant 0 : index
    %c0_139 = arith.constant 0 : index
    %163 = vector.load %arg3[%c0_138, %c0_139] : memref<12x1xf32, #tpu.memory_space<vmem>>, vector<12x1xf32>
    %164 = vector.broadcast %163 : vector<12x1xf32> to vector<12x512xf32>
    %165 = arith.addf %162, %164 : vector<12x512xf32>
    %cst_140 = arith.constant 0.000000e+00 : f32
    %166 = vector.broadcast %cst_140 : f32 to vector<12x512xf32>
    %167 = arith.cmpf ogt, %165, %166 : vector<12x512xf32>
    %c0_141 = arith.constant 0 : index
    %c0_142 = arith.constant 0 : index
    %168 = vector.load %arg4[%c0_141, %c0_142] : memref<12x1xf32, #tpu.memory_space<vmem>>, vector<12x1xf32>
    %169 = vector.broadcast %168 : vector<12x1xf32> to vector<12x512xf32>
    %170 = arith.mulf %169, %165 : vector<12x512xf32>
    %171 = arith.select %167, %165, %170 : vector<12x512xi1>, vector<12x512xf32>
    %c0_143 = arith.constant 0 : index
    %c0_144 = arith.constant 0 : index
    %172 = vector.load %arg5[%c0_143, %c0_144] : memref<12x512xf32, #tpu.memory_space<vmem>>, vector<12x512xf32>
    tpu.vector_store %arg5[%c0_143, %c0_144], %171 {strides = array<i32>} : memref<12x512xf32, #tpu.memory_space<vmem>>, vector<12x512xf32>,
    return
  }
  func.func @transform_0(%arg0: i32) -> (i32, i32, i32) {
    %c0_i32 = arith.constant 0 : i32
    %c0_i32_0 = arith.constant 0 : i32
    %c0_i32_1 = arith.constant 0 : i32
    return %arg0, %c0_i32, %c0_i32_0 : i32, i32, i32
  }
  func.func @transform_1(%arg0: i32) -> (i32, i32, i32) {
    %c0_i32 = arith.constant 0 : i32
    %c0_i32_0 = arith.constant 0 : i32
    %c0_i32_1 = arith.constant 0 : i32
    %c0_i32_2 = arith.constant 0 : i32
    return %c0_i32, %c0_i32_0, %c0_i32_1 : i32, i32, i32
  }
  func.func @transform_2(%arg0: i32) -> (i32, i32) {
    %c0_i32 = arith.constant 0 : i32
    %c0_i32_0 = arith.constant 0 : i32
    %c0_i32_1 = arith.constant 0 : i32
    return %c0_i32, %c0_i32_0 : i32, i32
  }
  func.func @transform_3(%arg0: i32) -> (i32, i32) {
    %c0_i32 = arith.constant 0 : i32
    %c0_i32_0 = arith.constant 0 : i32
    %c0_i32_1 = arith.constant 0 : i32
    return %c0_i32, %c0_i32_0 : i32, i32
  }
  func.func @transform_4(%arg0: i32) -> (i32, i32) {
    %c0_i32 = arith.constant 0 : i32
    %c0_i32_0 = arith.constant 0 : i32
    return %c0_i32, %arg0 : i32, i32
  }
}

</mosaic_0001>

<bundles_post_ra>
// kernel: tpu_custom_call.1
= control target key start
LH: loop header
LB: loop body
LE: loop exit
PB: predicated region body
PF: predicated region fallthrough
CT: control target
= control target key end

     0   :  { %9 = vsyncpa [#allocation3], 0  ;;  %s5431_s0 = inlined_call_operand.vmem [shape: f32[4,8,768], index: 0, kind: input, shape index: {}]   ;;  %s5432_s1 = inlined_call_operand.vmem [shape: f32[27,12,8], index: 1, kind: input, shape index: {}]   ;;  %s5433_s2 = inlined_call_operand.vmem [shape: f32[12,1], index: 2, kind: input, shape index: {}]   ;;  %s5434_s3 = inlined_call_operand.vmem [shape: f32[12,1], index: 3, kind: input, shape index: {}]   ;;  %s5435_s4 = inlined_call_operand.hbm [shape: f32[12,2048], index: 4, kind: output, shape index: {}]  }
   0x1   :  { %11 = vsyncpa [#allocation3 + $0x1], 0  ;;  %s4516_s15 = smov 0   ;;  %s4518_s16 = smov 0  }
   0x2   :  { %s4520_s17 = smov 0   ;;  %s4522_s18 = smov 0  }
   0x3 LB: > { %s4537_s19 = sadd.s32 4294967295, %s4459_s18   ;;  %s3780_s20 = sadd.s32 4294967294, %s4459_s18   ;;  %s4459_s18 = sphi %s4522_s18, %s5461_s18   ;;  %s4455_s17 = sphi %s4520_s17, %s5460_s17   ;;  %s4451_s16 = sphi %s4518_s16, %s5459_s16   ;;  %s4447_s15 = sphi %s4516_s15, %s5458_s15  }
   0x4   : > { %s4541_s21 = sadd.s32 1, %s4459_s18   ;;  %s113_s22 = sadd.s32 1, %s4455_s17 }
   0x5   : > { %s110_s23 = ssub.s32 %s4459_s18, %s4541_s21  ;;  %p123_p0 = scmp.ne.s32.totalorder %s4455_s17, %s4451_s16 }
   0x6   : > { %p111_p1 = scmp.eq.s32.totalorder %s110_s23, 0  ;;  %p124_p2 = scmp.eq.s32.totalorder %s4537_s19, 3 }
   0x7   : > { %p129_p3 = scmp.ne.s32.totalorder %s4451_s16, %s4447_s15  ;;  %p130_p4 = scmp.eq.s32.totalorder %s3780_s20, 3 }
   0x8   : > { %s4552_s24 = scalar_select %p111_p1, %s4455_s17, %s113_s22  }
   0x9   : > { %p4554_p5 = por %p124_p2, %p123_p0  ;;  %p4558_p6 = por %p130_p4, %p129_p3 }
   0xa   : > { %p3783_p7 = scmp.ge.s32.totalorder %s4459_s18, 1  ;;  %p165_p8 = scmp.lt.s32.totalorder %s4459_s18, 5 }
   0xc   : > { %p166_p9 = pnand %p3783_p7, %p165_p8 }
   0xe   : > { %169 = sbr.rel (%p166_p9) target bundleno = 722 (0x2d2), region = 36 }
  0x13   : > { %p191_p10 = scmp.lt.s32.totalorder %s4537_s19, 3  ;;  %s4461_s6 = smov 111   ;;  %vm222_vm0 = vcmask 900096   ;;  %vm340_vm1 = vcmask 908288   ;;  %vm460_vm2 = vcmask 891904   ;;  %v3786_v21 = vld [vmem:[%s5432_s1 + $0x10] sm:$0xff] }
  0x14   : > { %s4462_s7 = smov 110   ;;  %s4463_s8 = smov 109   ;;  %vm231_vm3 = vcmask 64512   ;;  %v3787_v31 = vld [vmem:[%s5432_s1 + $0x18] sm:$0xf]  ;;  %vm588_vm4 = vcmask 826368  }
  0x15   : > { %s192_s27 = scalar_select %p191_p10, %s4537_s19, 3  ;;  %v197_v42 = vld [vmem:[%s5432_s1] sm:$0xff]  ;;  %v198_v51 = vld [vmem:[%s5432_s1 + $0x8] sm:$0xf]  ;;  %vm716_vm5 = vcmask 818176   ;;  %vm844_vm6 = vcmask 809984  }
  0x16   : > { %s4464_s9 = smov 101   ;;  %s4465_s10 = smov 100   ;;  %v3804_v61 = vld [vmem:[%s5432_s1 + $0x20] sm:$0xff]  ;;  %vm972_vm7 = vcmask 744448   ;;  %vm1100_vm8 = vcmask 736256   ;;  %vm1228_vm9 = vcmask 728064  }
  0x17   : > { %s4060_s28 = smul.u32 48, %s192_s27  ;;  %s4466_s11 = smov 99   ;;  %vm1356_vm10 = vcmask 89088   ;;  %vm1484_vm11 = vcmask 80896   ;;  %vm1612_vm12 = vcmask 72704   ;;  %vm1740_vm13 = vcmask 7168  }
  0x18   : > { %s4467_s12 = smov 91   ;;  %s4468_s13 = smov 90   ;;  %vm1987_vm14 = vcmask 1039360   ;;  %vm2115_vm15 = vcmask 973824  }
  0x19   : > { %s4569_s5 = scalar_lea.vmem %s5431_s0, %s4060_s28  ;;  %s4469_s14 = smov 89  }
  0x1a   : > { %v4572_v0 = vld [vmem:[%s4569_s5 + $0x10] sm:$0xff]  ;;  %v4575_v1 = vld [vmem:[%s4569_s5 + $0x18] sm:$0xff]  ;;  %v199_v2 = vld [vmem:[%s4569_s5] sm:$0xff]  ;;  %s4470_s20 = smov 11   ;;  %s4471_s22 = smov 10  }
  0x1b   : > { %v4130_v3 = vpack.i.bf16 %v4575_v1, %v4572_v0  ;;  %v4581_v4 = vld [vmem:[%s4569_s5 + $0x8] sm:$0xff]  ;;  %v4584_v5 = vld [vmem:[%s4569_s5 + $0x20] sm:$0xff]  ;;  %s4472_s23 = smov 9   ;;  %s4473_s27 = smov 1  }
  0x1c   : > { %v4135_v6 = vpack.i.bf16 %v4581_v4, %v199_v2  ;;  %338 = vrot.lane.b32.xlu2 %v4584_v5, %s4461_s6  ;;  %s4474_s30 = smov 127   ;;  %s4479_s29 = smov 38  }
  0x1d   : > { %4131 = vrot.lane.b32.xlu0 %v4130_v3, %s4462_s7  ;;  %s4484_s28 = smov 19  }
  0x1e   : > { %4136 = vrot.lane.b32.xlu1 %v4135_v6, %s4462_s7 }
  0x24   : > { %4146 = vrot.lane.b32.xlu2 %v4135_v6, %s4461_s6 }
  0x25   : > { %220 = vrot.lane.b32.xlu0 %v4584_v5, %s4462_s7  ;;  %s4480_s7 = smov 37  }
  0x26   : > { %4141 = vrot.lane.b32.xlu1 %v4130_v3, %s4461_s6  ;;  %s4485_s6 = smov 18  }
  0x2c   : > { %4156 = vrot.lane.b32.xlu2 %v4135_v6, %s4463_s8 }
  0x2d   : > { %4151 = vrot.lane.b32.xlu0 %v4130_v3, %s4463_s8 }
  0x2e   : > { %458 = vrot.lane.b32.xlu1 %v4584_v5, %s4463_s8  ;;  %s4475_s8 = smov 119  }
  0x34   : > { %4166 = vrot.lane.b32.xlu2 %v4135_v6, %s4464_s9 }
  0x35   : > { %4161 = vrot.lane.b32.xlu0 %v4130_v3, %s4464_s9 }
  0x36   : > { %586 = vrot.lane.b32.xlu1 %v4584_v5, %s4464_s9  ;;  %s4486_s9 = smov 17  }
  0x3c   : > { %4176 = vrot.lane.b32.xlu2 %v4135_v6, %s4465_s10 }
  0x3d   : > { %4171 = vrot.lane.b32.xlu0 %v4130_v3, %s4465_s10 }
  0x3e   : > { %714 = vrot.lane.b32.xlu1 %v4584_v5, %s4465_s10  ;;  %s4481_s10 = smov 29  }
  0x44   : > { %4186 = vrot.lane.b32.xlu2 %v4135_v6, %s4466_s11 }
  0x45   : > { %4181 = vrot.lane.b32.xlu0 %v4130_v3, %s4466_s11 }
  0x46   : > { %842 = vrot.lane.b32.xlu1 %v4584_v5, %s4466_s11  ;;  %s4476_s11 = smov 118  }
  0x4c   : > { %4196 = vrot.lane.b32.xlu2 %v4135_v6, %s4467_s12 }
  0x4d   : > { %4191 = vrot.lane.b32.xlu0 %v4130_v3, %s4467_s12 }
  0x4e   : > { %970 = vrot.lane.b32.xlu1 %v4584_v5, %s4467_s12 }
  0x54   : > { %4206 = vrot.lane.b32.xlu2 %v4135_v6, %s4468_s13 }
  0x55   : > { %4201 = vrot.lane.b32.xlu0 %v4130_v3, %s4468_s13 }
  0x56   : > { %1098 = vrot.lane.b32.xlu1 %v4584_v5, %s4468_s13  ;;  %s4482_s13 = smov 28  }
  0x5c   : > { %4216 = vrot.lane.b32.xlu2 %v4135_v6, %s4469_s14 }
  0x5d   : > { %4211 = vrot.lane.b32.xlu0 %v4130_v3, %s4469_s14 }
  0x5e   : > { %1226 = vrot.lane.b32.xlu1 %v4584_v5, %s4469_s14  ;;  %s4477_s14 = smov 117  }
  0x64   : > { %4226 = vrot.lane.b32.xlu2 %v4135_v6, %s4470_s20 }
  0x65   : > { %4221 = vrot.lane.b32.xlu0 %v4130_v3, %s4470_s20 }
  0x66   : > { %1354 = vrot.lane.b32.xlu1 %v4584_v5, %s4470_s20 }
  0x6c   : > { %4236 = vrot.lane.b32.xlu2 %v4135_v6, %s4471_s22 }
  0x6d   : > { %4231 = vrot.lane.b32.xlu0 %v4130_v3, %s4471_s22 }
  0x6e   : > { %1482 = vrot.lane.b32.xlu1 %v4584_v5, %s4471_s22  ;;  %s4483_s22 = smov 27  }
  0x74   : > { %4246 = vrot.lane.b32.xlu2 %v4135_v6, %s4472_s23 }
  0x75   : > { %4241 = vrot.lane.b32.xlu0 %v4130_v3, %s4472_s23 }
  0x76   : > { %1610 = vrot.lane.b32.xlu1 %v4584_v5, %s4472_s23  ;;  %v339_v7 = vpop.permute.xlu2 %338  ;;  %s4478_s23 = smov 39  }
  0x7c   : > { %4256 = vrot.lane.b32.xlu2 %v4135_v6, %s4473_s27 }
  0x7d   : > { %4251 = vrot.lane.b32.xlu0 %v4130_v3, %s4473_s27 }
  0x7e   : > { %1738 = vrot.lane.b32.xlu1 %v4584_v5, %s4473_s27  ;;  %v4147_v8 = vpop.permute.xlu2 %4146  ;;  %s188_s27 = sand.u32 1, %s4451_s16  }
  0x7f   : > { %v4149_v11 = vunpack.i.h.bf16 %v4147_v8  ;;  %v4148_v12 = vunpack.i.l.bf16 %v4147_v8 }
  0x81   : > { %v341_v24 = vsel %vm340_vm1, %v4148_v12, %v4149_v11 }
  0x86   : > { %v4157_v9 = vpop.permute.xlu2 %4156 }
  0x87   : > { %v4159_v16 = vunpack.i.h.bf16 %v4157_v9  ;;  %v4158_v17 = vunpack.i.l.bf16 %v4157_v9 }
  0x89   : > { %v461_v25 = vsel %vm460_vm2, %v4158_v17, %v4159_v16 }
  0x8e   : > { %v4167_v35 = vpop.permute.xlu2 %4166 }
  0x8f   : > { %v4132_v10 = vpop.permute.xlu0 %4131  ;;  %v4169_v40 = vunpack.i.h.bf16 %v4167_v35  ;;  %v4168_v41 = vunpack.i.l.bf16 %v4167_v35  ;;  %v3825_v35 = vld [vmem:[%s5432_s1 + $0x48] sm:$0xf] }
  0x90   : > { %v4134_v13 = vunpack.i.h.bf16 %v4132_v10  ;;  %v4133_v14 = vunpack.i.l.bf16 %v4132_v10  ;;  %v4137_v15 = vpop.permute.xlu1 %4136 }
  0x91   : > { %v4139_v18 = vunpack.i.h.bf16 %v4137_v15  ;;  %v4138_v19 = vunpack.i.l.bf16 %v4137_v15  ;;  %v589_v46 = vsel %vm588_vm4, %v4168_v41, %v4169_v40 }
  0x92   : > { %v225_v20 = vsel %vm222_vm0, %v4133_v14, %v4134_v13 }
  0x93   : > { %v223_v22 = vsel %vm222_vm0, %v4138_v19, %v4139_v18  ;;  %v224_v23 = vsel %vm222_vm0, %v4139_v18, %v4133_v14  ;;  %299 = vmatpush.msra.mxu2 %v225_v20  ;;  %v3814_v14 = vld [vmem:[%s5432_s1 + $0x30] sm:$0xff]  ;;  %v3815_v20 = vld [vmem:[%s5432_s1 + $0x38] sm:$0xf] }
  0x94   : > { %253 = vmatpush.msra.mxu0 %v223_v22  ;;  %276 = vmatpush.msra.mxu1 %v224_v23 }
  0x95   : > { %3788 = vmatmul.msk.f32.vlgmr.msra.gmra.mxu0 %vm231_vm3, %v3786_v21  ;;  %3790 = vmatmul.msk.f32.vlgmr.msra.gmra.mxu1 %vm231_vm3, %v3786_v21 }
  0x96   : > { %3792 = vmatmul.msk.f32.vlgmr.msra.gmra.mxu2 %vm231_vm3, %v3786_v21  ;;  %370 = vmatpush.msrb.mxu0 %v341_v24  ;;  %v4177_v55 = vpop.permute.xlu2 %4176 }
  0x97   : > { %v221_v26 = vpop.permute.xlu0 %220  ;;  %v4179_v59 = vunpack.i.h.bf16 %v4177_v55  ;;  %v4178_v60 = vunpack.i.l.bf16 %v4177_v55 }
  0x98   : > { %490 = vmatpush.msra.mxu0 %v461_v25  ;;  %v4142_v27 = vpop.permute.xlu1 %4141  ;;  %v226_v28 = vsel %vm222_vm0, %v4134_v13, %v221_v26  ;;  %vm2243_vm0 = vcmask 965632  }
  0x99   : > { %v4144_v29 = vunpack.i.h.bf16 %v4142_v27  ;;  %v4143_v30 = vunpack.i.l.bf16 %v4142_v27  ;;  %322 = vmatpush.msra.mxu3 %v226_v28  ;;  %v717_v3 = vsel %vm716_vm5, %v4178_v60, %v4179_v59  ;;  %v3824_v27 = vld [vmem:[%s5432_s1 + $0x40] sm:$0xff] }
  0x9a   : > { %3794 = vmatmul.msk.f32.vlgmr.msra.gmra.mxu3 %vm231_vm3, %v3786_v21 }
  0x9b   : > { %v342_v32 = vsel %vm340_vm1, %v4149_v11, %v4143_v30  ;;  %v343_v33 = vsel %vm340_vm1, %v4143_v30, %v4144_v29  ;;  %v344_v34 = vsel %vm340_vm1, %v4144_v29, %v339_v7  ;;  %v3805_v7 = vld [vmem:[%s5432_s1 + $0x28] sm:$0xf]  ;;  %vm2371_vm1 = vcmask 957440  }
  0x9c   : > { %393 = vmatpush.msrb.mxu1 %v342_v32  ;;  %416 = vmatpush.msrb.mxu2 %v343_v33  ;;  %v4680_v32 = vpack.i.bf16 %v4584_v5, %v4575_v1  ;;  %v4683_v33 = vld [vmem:[%s4569_s5 + $0x28] sm:$0xff] }
  0x9d   : > { %439 = vmatpush.msrb.mxu3 %v344_v34  ;;  %3789 = vmatmul.msk.f32.gmra.mxu0 %vm231_vm3, %v3787_v31 }
  0x9e   : > { %3791 = vmatmul.msk.f32.gmra.mxu1 %vm231_vm3, %v3787_v31  ;;  %3793 = vmatmul.msk.f32.gmra.mxu2 %vm231_vm3, %v3787_v31  ;;  %v4187_v9 = vpop.permute.xlu2 %4186 }
  0x9f   : > { %v4152_v36 = vpop.permute.xlu0 %4151  ;;  %v4189_v12 = vunpack.i.h.bf16 %v4187_v9  ;;  %v4188_v13 = vunpack.i.l.bf16 %v4187_v9  ;;  %4261 = vrot.lane.b32.xlu0 %v4680_v32, %s4474_s30  ;;  %1985 = vrot.lane.b32.xlu1 %v4683_v33, %s4474_s30  ;;  %v3854_v9 = vld [vmem:[%s5432_s1 + $0x70] sm:$0xff] }
  0xa0   : > { %v4154_v37 = vunpack.i.h.bf16 %v4152_v36  ;;  %v4153_v38 = vunpack.i.l.bf16 %v4152_v36  ;;  %v459_v39 = vpop.permute.xlu1 %458 }
  0xa1   : > { %v845_v18 = vsel %vm844_vm6, %v4188_v13, %v4189_v12 }
  0xa2   : > { %3795 = vmatmul.msk.f32.gmra.mxu3 %vm231_vm3, %v3787_v31  ;;  %v464_v43 = vsel %vm460_vm2, %v4154_v37, %v459_v39  ;;  %v462_v44 = vsel %vm460_vm2, %v4159_v16, %v4153_v38  ;;  %v463_v45 = vsel %vm460_vm2, %v4153_v38, %v4154_v37  ;;  %vm2499_vm2 = vcmask 318464  }
  0xa3   : > { %513 = vmatpush.msra.mxu1 %v462_v44  ;;  %536 = vmatpush.msra.mxu2 %v463_v45 }
  0xa4   : > { %559 = vmatpush.msra.mxu3 %v464_v43 }
  0xa5   : > { %3796 = vmatmul.msk.f32.vlgmr.msrb.gmra.mxu0 %vm231_vm3, %v197_v42 }
  0xa6   : > { %3798 = vmatmul.msk.f32.vlgmr.msrb.gmra.mxu1 %vm231_vm3, %v197_v42  ;;  %3800 = vmatmul.msk.f32.vlgmr.msrb.gmra.mxu2 %vm231_vm3, %v197_v42  ;;  %v4197_v22 = vpop.permute.xlu2 %4196 }
  0xa7   : > { %v4162_v47 = vpop.permute.xlu0 %4161  ;;  %618 = vmatpush.msrb.mxu0 %v589_v46  ;;  %v4199_v25 = vunpack.i.h.bf16 %v4197_v22  ;;  %v4198_v26 = vunpack.i.l.bf16 %v4197_v22  ;;  %4271 = vrot.lane.b32.xlu0 %v4680_v32, %s4475_s8 }
  0xa8   : > { %v4164_v48 = vunpack.i.h.bf16 %v4162_v47  ;;  %v4163_v49 = vunpack.i.l.bf16 %v4162_v47  ;;  %v587_v50 = vpop.permute.xlu1 %586  ;;  %2113 = vrot.lane.b32.xlu1 %v4683_v33, %s4475_s8 }
  0xa9   : > { %v973_v31 = vsel %vm972_vm7, %v4198_v26, %v4199_v25 }
  0xaa   : > { %3802 = vmatmul.msk.f32.vlgmr.msrb.gmra.mxu3 %vm231_vm3, %v197_v42  ;;  %v592_v52 = vsel %vm588_vm4, %v4164_v48, %v587_v50  ;;  %v590_v53 = vsel %vm588_vm4, %v4169_v40, %v4163_v49  ;;  %v591_v54 = vsel %vm588_vm4, %v4163_v49, %v4164_v48  ;;  %v3834_v42 = vld [vmem:[%s5432_s1 + $0x50] sm:$0xff]  ;;  %v3835_v48 = vld [vmem:[%s5432_s1 + $0x58] sm:$0xf]  ;;  %vm2627_vm4 = vcmask 310272  }
  0xab   : > { %641 = vmatpush.msrb.mxu1 %v590_v53  ;;  %664 = vmatpush.msrb.mxu2 %v591_v54 }
  0xac   : > { %687 = vmatpush.msrb.mxu3 %v592_v52 }
  0xad   : > { %3797 = vmatmul.msk.f32.gmra.mxu0 %vm231_vm3, %v198_v51 }
  0xae   : > { %3799 = vmatmul.msk.f32.gmra.mxu1 %vm231_vm3, %v198_v51  ;;  %3801 = vmatmul.msk.f32.gmra.mxu2 %vm231_vm3, %v198_v51  ;;  %v4207_v37 = vpop.permute.xlu2 %4206 }
  0xaf   : > { %v4172_v56 = vpop.permute.xlu0 %4171  ;;  %v4209_v40 = vunpack.i.h.bf16 %v4207_v37  ;;  %v4208_v41 = vunpack.i.l.bf16 %v4207_v37  ;;  %4281 = vrot.lane.b32.xlu0 %v4680_v32, %s4476_s11 }
  0xb0   : > { %v4174_v57 = vunpack.i.h.bf16 %v4172_v56  ;;  %v4173_v58 = vunpack.i.l.bf16 %v4172_v56  ;;  %v715_v2 = vpop.permute.xlu1 %714  ;;  %2241 = vrot.lane.b32.xlu1 %v4683_v33, %s4476_s11  ;;  %v3844_v56 = vld [vmem:[%s5432_s1 + $0x60] sm:$0xff] }
  0xb1   : > { %v1101_v46 = vsel %vm1100_vm8, %v4208_v41, %v4209_v40 }
  0xb2   : > { %3803 = vmatmul.msk.f32.gmra.mxu3 %vm231_vm3, %v198_v51  ;;  %v718_v62 = vsel %vm716_vm5, %v4179_v59, %v4173_v58  ;;  %v719_v63 = vsel %vm716_vm5, %v4173_v58, %v4174_v57  ;;  %v720_v6 = vsel %vm716_vm5, %v4174_v57, %v715_v2  ;;  %v4720_v51 = vpack.i.bf16 %v4572_v0, %v4581_v4 }
  0xb3   : > { %vm2755_vm5 = vcmask 302080  }
  0xb4   : > { %4266 = vrot.lane.b32.xlu2 %v4720_v51, %s4474_s30  ;;  %s4059_s30 = sshll.u32 %s4537_s19, 5 }
  0xb5   : > { %3806 = vmatmul.msk.f32.vlgmr.msra.gmra.mxu0 %vm231_vm3, %v3804_v61 }
  0xb6   : > { %3808 = vmatmul.msk.f32.vlgmr.msra.gmra.mxu1 %vm231_vm3, %v3804_v61  ;;  %3810 = vmatmul.msk.f32.vlgmr.msra.gmra.mxu2 %vm231_vm3, %v3804_v61  ;;  %v4217_v50 = vpop.permute.xlu2 %4216 }
  0xb7   : > { %769 = vmatpush.msra.mxu1 %v718_v62  ;;  %792 = vmatpush.msra.mxu2 %v719_v63  ;;  %v4182_v8 = vpop.permute.xlu0 %4181  ;;  %v4219_v54 = vunpack.i.h.bf16 %v4217_v50  ;;  %v4218_v55 = vunpack.i.l.bf16 %v4217_v50  ;;  %v3845_v62 = vld [vmem:[%s5432_s1 + $0x68] sm:$0xf] }
  0xb8   : > { %746 = vmatpush.msra.mxu0 %v717_v3  ;;  %v4184_v10 = vunpack.i.h.bf16 %v4182_v8  ;;  %v4183_v11 = vunpack.i.l.bf16 %v4182_v8  ;;  %v843_v17 = vpop.permute.xlu1 %842  ;;  %4291 = vrot.lane.b32.xlu0 %v4680_v32, %s4477_s14 }
  0xb9   : > { %2369 = vrot.lane.b32.xlu1 %v4683_v33, %s4477_s14  ;;  %v1229_v60 = vsel %vm1228_vm9, %v4218_v55, %v4219_v54 }
  0xba   : > { %3812 = vmatmul.msk.f32.vlgmr.msra.gmra.mxu3 %vm231_vm3, %v3804_v61  ;;  %v846_v15 = vsel %vm844_vm6, %v4189_v12, %v4183_v11  ;;  %v847_v16 = vsel %vm844_vm6, %v4183_v11, %v4184_v10  ;;  %v848_v19 = vsel %vm844_vm6, %v4184_v10, %v843_v17  ;;  %vm2883_vm6 = vcmask 236544  }
  0xbb   : > { %815 = vmatpush.msra.mxu3 %v720_v6 }
  0xbc   : > { %4276 = vrot.lane.b32.xlu2 %v4720_v51, %s4475_s8  ;;  %s3714_s8 = scalar_lea.hbm %s5435_s4, %s4059_s30 }
  0xbd   : > { %3807 = vmatmul.msk.f32.gmra.mxu0 %vm231_vm3, %v3805_v7 }
  0xbe   : > { %3809 = vmatmul.msk.f32.gmra.mxu1 %vm231_vm3, %v3805_v7  ;;  %3811 = vmatmul.msk.f32.gmra.mxu2 %vm231_vm3, %v3805_v7  ;;  %v4227_v2 = vpop.permute.xlu2 %4226 }
  0xbf   : > { %v4192_v21 = vpop.permute.xlu0 %4191  ;;  %v4228_v8 = vunpack.i.l.bf16 %v4227_v2 }
  0xc0   : > { %v4194_v23 = vunpack.i.h.bf16 %v4192_v21  ;;  %v4193_v24 = vunpack.i.l.bf16 %v4192_v21  ;;  %v971_v30 = vpop.permute.xlu1 %970  ;;  %4301 = vrot.lane.b32.xlu0 %v4680_v32, %s4478_s23 }
  0xc1   : > { %2497 = vrot.lane.b32.xlu1 %v4683_v33, %s4478_s23 }
  0xc2   : > { %3813 = vmatmul.msk.f32.gmra.mxu3 %vm231_vm3, %v3805_v7  ;;  %v974_v28 = vsel %vm972_vm7, %v4199_v25, %v4193_v24  ;;  %v975_v29 = vsel %vm972_vm7, %v4193_v24, %v4194_v23  ;;  %v976_v34 = vsel %vm972_vm7, %v4194_v23, %v971_v30  ;;  %v4229_v7 = vunpack.i.h.bf16 %v4227_v2  ;;  %v3864_v24 = vld [vmem:[%s5432_s1 + $0x80] sm:$0xff] }
  0xc3   : > { %vm3011_vm7 = vcmask 228352  }
  0xc4   : > { %4286 = vrot.lane.b32.xlu2 %v4720_v51, %s4476_s11  ;;  %v1357_v13 = vsel %vm1356_vm10, %v4228_v8, %v4229_v7  ;;  %s3703_s11 = scalar_lea.sflag [#allocation3], %s188_s27 }
  0xc5   : > { %3816 = vmatmul.msk.f32.vlgmr.msrb.gmra.mxu0 %vm231_vm3, %v3814_v14 }
  0xc6   : > { %3818 = vmatmul.msk.f32.vlgmr.msrb.gmra.mxu1 %vm231_vm3, %v3814_v14  ;;  %3820 = vmatmul.msk.f32.vlgmr.msrb.gmra.mxu2 %vm231_vm3, %v3814_v14  ;;  %v4237_v17 = vpop.permute.xlu2 %4236 }
  0xc7   : > { %897 = vmatpush.msrb.mxu1 %v846_v15  ;;  %920 = vmatpush.msrb.mxu2 %v847_v16  ;;  %v4202_v36 = vpop.permute.xlu0 %4201  ;;  %v3855_v15 = vld [vmem:[%s5432_s1 + $0x78] sm:$0xf]  ;;  %v4238_v21 = vunpack.i.l.bf16 %v4237_v17 }
  0xc8   : > { %874 = vmatpush.msrb.mxu0 %v845_v18  ;;  %v4204_v38 = vunpack.i.h.bf16 %v4202_v36  ;;  %v4203_v39 = vunpack.i.l.bf16 %v4202_v36  ;;  %v1099_v45 = vpop.permute.xlu1 %1098  ;;  %4311 = vrot.lane.b32.xlu0 %v4680_v32, %s4479_s29 }
  0xc9   : > { %2625 = vrot.lane.b32.xlu1 %v4683_v33, %s4479_s29 }
  0xca   : > { %3822 = vmatmul.msk.f32.vlgmr.msrb.gmra.mxu3 %vm231_vm3, %v3814_v14  ;;  %v1102_v43 = vsel %vm1100_vm8, %v4209_v40, %v4203_v39  ;;  %v1103_v44 = vsel %vm1100_vm8, %v4203_v39, %v4204_v38  ;;  %v1104_v47 = vsel %vm1100_vm8, %v4204_v38, %v1099_v45  ;;  %v3874_v45 = vld [vmem:[%s5432_s1 + $0x90] sm:$0xff]  ;;  %vm3139_vm8 = vcmask 220160  }
  0xcb   : > { %943 = vmatpush.msrb.mxu3 %v848_v19 }
  0xcc   : > { %4296 = vrot.lane.b32.xlu2 %v4720_v51, %s4477_s14  ;;  %s4417_s14 = scalar_lea.hbm %s5435_s4, 256 }
  0xcd   : > { %3817 = vmatmul.msk.f32.gmra.mxu0 %vm231_vm3, %v3815_v20 }
  0xce   : > { %3819 = vmatmul.msk.f32.gmra.mxu1 %vm231_vm3, %v3815_v20  ;;  %3821 = vmatmul.msk.f32.gmra.mxu2 %vm231_vm3, %v3815_v20  ;;  %v4247_v38 = vpop.permute.xlu2 %4246 }
  0xcf   : > { %v4212_v49 = vpop.permute.xlu0 %4211  ;;  %v4249_v41 = vunpack.i.h.bf16 %v4247_v38 }
  0xd0   : > { %v4214_v52 = vunpack.i.h.bf16 %v4212_v49  ;;  %v4213_v53 = vunpack.i.l.bf16 %v4212_v49  ;;  %v1227_v59 = vpop.permute.xlu1 %1226  ;;  %4321 = vrot.lane.b32.xlu0 %v4680_v32, %s4480_s7 }
  0xd1   : > { %2753 = vrot.lane.b32.xlu1 %v4683_v33, %s4480_s7 }
  0xd2   : > { %3823 = vmatmul.msk.f32.gmra.mxu3 %vm231_vm3, %v3815_v20  ;;  %v1230_v57 = vsel %vm1228_vm9, %v4219_v54, %v4213_v53  ;;  %v1231_v58 = vsel %vm1228_vm9, %v4213_v53, %v4214_v52  ;;  %v1232_v61 = vsel %vm1228_vm9, %v4214_v52, %v1227_v59  ;;  %v4239_v20 = vunpack.i.h.bf16 %v4237_v17 }
  0xd3   : > { %vm3267_vm9 = vcmask 154624  }
  0xd4   : > { %4306 = vrot.lane.b32.xlu2 %v4720_v51, %s4478_s23 }
  0xd5   : > { %3826 = vmatmul.msk.f32.vlgmr.msra.gmra.mxu0 %vm231_vm3, %v3824_v27 }
  0xd6   : > { %3828 = vmatmul.msk.f32.vlgmr.msra.gmra.mxu1 %vm231_vm3, %v3824_v27  ;;  %3830 = vmatmul.msk.f32.vlgmr.msra.gmra.mxu2 %vm231_vm3, %v3824_v27 }
  0xd7   : > { %1025 = vmatpush.msra.mxu1 %v974_v28  ;;  %1048 = vmatpush.msra.mxu2 %v975_v29  ;;  %v4222_v63 = vpop.permute.xlu0 %4221  ;;  %v1485_v28 = vsel %vm1484_vm11, %v4238_v21, %v4239_v20  ;;  %v3885_v21 = vld [vmem:[%s5432_s1 + $0xa8] sm:$0xf] }
  0xd8   : > { %1002 = vmatpush.msra.mxu0 %v973_v31  ;;  %v4224_v3 = vunpack.i.h.bf16 %v4222_v63  ;;  %v4223_v6 = vunpack.i.l.bf16 %v4222_v63  ;;  %v1355_v12 = vpop.permute.xlu1 %1354  ;;  %4331 = vrot.lane.b32.xlu0 %v4680_v32, %s4481_s10 }
  0xd9   : > { %2881 = vrot.lane.b32.xlu1 %v4683_v33, %s4481_s10 }
  0xda   : > { %3832 = vmatmul.msk.f32.vlgmr.msra.gmra.mxu3 %vm231_vm3, %v3824_v27  ;;  %v1358_v10 = vsel %vm1356_vm10, %v4229_v7, %v4223_v6  ;;  %v1359_v11 = vsel %vm1356_vm10, %v4223_v6, %v4224_v3  ;;  %v1360_v14 = vsel %vm1356_vm10, %v4224_v3, %v1355_v12  ;;  %vm3395_vm10 = vcmask 146432  }
  0xdb   : > { %1071 = vmatpush.msra.mxu3 %v976_v34  ;;  %v3865_v34 = vld [vmem:[%s5432_s1 + $0x88] sm:$0xf] }
  0xdc   : > { %4316 = vrot.lane.b32.xlu2 %v4720_v51, %s4479_s29 }
  0xdd   : > { %3827 = vmatmul.msk.f32.gmra.mxu0 %vm231_vm3, %v3825_v35 }
  0xde   : > { %3829 = vmatmul.msk.f32.gmra.mxu1 %vm231_vm3, %v3825_v35  ;;  %3831 = vmatmul.msk.f32.gmra.mxu2 %vm231_vm3, %v3825_v35 }
  0xdf   : > { %v4232_v16 = vpop.permute.xlu0 %4231 }
  0xe0   : > { %v4234_v18 = vunpack.i.h.bf16 %v4232_v16  ;;  %v4233_v19 = vunpack.i.l.bf16 %v4232_v16  ;;  %v1483_v27 = vpop.permute.xlu1 %1482  ;;  %4341 = vrot.lane.b32.xlu0 %v4680_v32, %s4482_s13 }
  0xe1   : > { %3009 = vrot.lane.b32.xlu1 %v4683_v33, %s4482_s13 }
  0xe2   : > { %3833 = vmatmul.msk.f32.gmra.mxu3 %vm231_vm3, %v3825_v35  ;;  %v1486_v25 = vsel %vm1484_vm11, %v4239_v20, %v4233_v19  ;;  %v1487_v26 = vsel %vm1484_vm11, %v4233_v19, %v4234_v18  ;;  %v1488_v29 = vsel %vm1484_vm11, %v4234_v18, %v1483_v27  ;;  %vm3523_vm11 = vcmask 138240  }
  0xe4   : > { %4326 = vrot.lane.b32.xlu2 %v4720_v51, %s4480_s7 }
  0xe5   : > { %3836 = vmatmul.msk.f32.vlgmr.msrb.gmra.mxu0 %vm231_vm3, %v3834_v42 }
  0xe6   : > { %3838 = vmatmul.msk.f32.vlgmr.msrb.gmra.mxu1 %vm231_vm3, %v3834_v42  ;;  %3840 = vmatmul.msk.f32.vlgmr.msrb.gmra.mxu2 %vm231_vm3, %v3834_v42 }
  0xe7   : > { %1153 = vmatpush.msrb.mxu1 %v1102_v43  ;;  %1176 = vmatpush.msrb.mxu2 %v1103_v44  ;;  %v4242_v36 = vpop.permute.xlu0 %4241  ;;  %v4248_v43 = vunpack.i.l.bf16 %v4247_v38 }
  0xe8   : > { %1130 = vmatpush.msrb.mxu0 %v1101_v46  ;;  %v4244_v39 = vunpack.i.h.bf16 %v4242_v36  ;;  %v4243_v40 = vunpack.i.l.bf16 %v4242_v36  ;;  %4351 = vrot.lane.b32.xlu0 %v4680_v32, %s4483_s22  ;;  %v1611_v50 = vpop.permute.xlu1 %1610 }
  0xe9   : > { %3137 = vrot.lane.b32.xlu1 %v4683_v33, %s4483_s22  ;;  %v1613_v52 = vsel %vm1612_vm12, %v4248_v43, %v4249_v41 }
  0xea   : > { %3842 = vmatmul.msk.f32.vlgmr.msrb.gmra.mxu3 %vm231_vm3, %v3834_v42  ;;  %v1616_v53 = vsel %vm1612_vm12, %v4244_v39, %v1611_v50 }
  0xeb   : > { %1199 = vmatpush.msrb.mxu3 %v1104_v47  ;;  %v1614_v47 = vsel %vm1612_vm12, %v4249_v41, %v4243_v40 }
  0xec   : > { %4336 = vrot.lane.b32.xlu2 %v4720_v51, %s4481_s10  ;;  %s3717_s10 = sshll.u32 %s3714_s8, 4  ;;  %s3718_s10 = int_to_ptr.hbm [resolvable:$true] %s3717_s10 }
  0xed   : > { %3837 = vmatmul.msk.f32.gmra.mxu0 %vm231_vm3, %v3835_v48 }
  0xee   : > { %3839 = vmatmul.msk.f32.gmra.mxu1 %vm231_vm3, %v3835_v48  ;;  %3841 = vmatmul.msk.f32.gmra.mxu2 %vm231_vm3, %v3835_v48 }
  0xef   : > { %v4252_v59 = vpop.permute.xlu0 %4251 }
  0xf0   : > { %4361 = vrot.lane.b32.xlu0 %v4680_v32, %s4484_s28  ;;  %v4254_v63 = vunpack.i.h.bf16 %v4252_v59  ;;  %v4253_v2 = vunpack.i.l.bf16 %v4252_v59 }
  0xf1   : > { %3265 = vrot.lane.b32.xlu1 %v4683_v33, %s4484_s28 }
  0xf2   : > { %3843 = vmatmul.msk.f32.gmra.mxu3 %vm231_vm3, %v3835_v48  ;;  %v1615_v48 = vsel %vm1612_vm12, %v4243_v40, %v4244_v39  ;;  %v3895_v40 = vld [vmem:[%s5432_s1 + $0xb8] sm:$0xf] }
  0xf4   : > { %4346 = vrot.lane.b32.xlu2 %v4720_v51, %s4482_s13 }
  0xf5   : > { %3846 = vmatmul.msk.f32.vlgmr.msra.gmra.mxu0 %vm231_vm3, %v3844_v56 }
  0xf6   : > { %3848 = vmatmul.msk.f32.vlgmr.msra.gmra.mxu1 %vm231_vm3, %v3844_v56  ;;  %3850 = vmatmul.msk.f32.vlgmr.msra.gmra.mxu2 %vm231_vm3, %v3844_v56 }
  0xf7   : > { %1281 = vmatpush.msra.mxu1 %v1230_v57  ;;  %1304 = vmatpush.msra.mxu2 %v1231_v58  ;;  %v3875_v57 = vld [vmem:[%s5432_s1 + $0x98] sm:$0xf] }
  0xf8   : > { %1258 = vmatpush.msra.mxu0 %v1229_v60  ;;  %4371 = vrot.lane.b32.xlu0 %v4680_v32, %s4485_s6 }
  0xf9   : > { %3393 = vrot.lane.b32.xlu1 %v4683_v33, %s4485_s6 }
  0xfa   : > { %3852 = vmatmul.msk.f32.vlgmr.msra.gmra.mxu3 %vm231_vm3, %v3844_v56 }
  0xfb   : > { %1327 = vmatpush.msra.mxu3 %v1232_v61  ;;  %v4257_v61 = vpop.permute.xlu2 %4256 }
  0xfc   : > { %v4259_v3 = vunpack.i.h.bf16 %v4257_v61  ;;  %v4258_v7 = vunpack.i.l.bf16 %v4257_v61  ;;  %4356 = vrot.lane.b32.xlu2 %v4720_v51, %s4483_s22 }
  0xfd   : > { %3847 = vmatmul.msk.f32.gmra.mxu0 %vm231_vm3, %v3845_v62 }
  0xfe   : > { %3849 = vmatmul.msk.f32.gmra.mxu1 %vm231_vm3, %v3845_v62  ;;  %3851 = vmatmul.msk.f32.gmra.mxu2 %vm231_vm3, %v3845_v62  ;;  %v1742_v12 = vsel %vm1740_vm13, %v4259_v3, %v4253_v2 }
 0x101   : > { %3521 = vrot.lane.b32.xlu1 %v4683_v33, %s4486_s9 }
 0x102   : > { %3853 = vmatmul.msk.f32.gmra.mxu3 %vm231_vm3, %v3845_v62 }
 0x104   : > { %4366 = vrot.lane.b32.xlu2 %v4720_v51, %s4484_s28  ;;  %s3784_s28 = sshll.u32 %s188_s27, 6 }
 0x105   : > { %3856 = vmatmul.msk.f32.vlgmr.msrb.gmra.mxu0 %vm231_vm3, %v3854_v9  ;;  %s5375_s29 = scalar_lea.vmem [#allocation2], %s3784_s28 }
 0x106   : > { %3858 = vmatmul.msk.f32.vlgmr.msrb.gmra.mxu1 %vm231_vm3, %v3854_v9  ;;  %3860 = vmatmul.msk.f32.vlgmr.msrb.gmra.mxu2 %vm231_vm3, %v3854_v9  ;;  %s3715_s19 = sshll.u32 %s5375_s29, 4  ;;  %s3716_s19 = int_to_ptr.vmem [resolvable:$true] %s3715_s19 }
 0x107   : > { %1409 = vmatpush.msrb.mxu1 %v1358_v10  ;;  %1432 = vmatpush.msrb.mxu2 %v1359_v11  ;;  %v3884_v10 = vld [vmem:[%s5432_s1 + $0xa0] sm:$0xff] }
 0x108   : > { %1386 = vmatpush.msrb.mxu0 %v1357_v13  ;;  %v1743_v13 = vsel %vm1740_vm13, %v4253_v2, %v4254_v63 }
 0x10a   : > { %3862 = vmatmul.msk.f32.vlgmr.msrb.gmra.mxu3 %vm231_vm3, %v3854_v9 }
 0x10b   : > { %1455 = vmatpush.msrb.mxu3 %v1360_v14  ;;  %v1739_v14 = vpop.permute.xlu1 %1738 }
 0x10c   : > { %v1744_v17 = vsel %vm1740_vm13, %v4254_v63, %v1739_v14  ;;  %4376 = vrot.lane.b32.xlu2 %v4720_v51, %s4485_s6 }
 0x10d   : > { %3857 = vmatmul.msk.f32.gmra.mxu0 %vm231_vm3, %v3855_v15 }
 0x10e   : > { %3859 = vmatmul.msk.f32.gmra.mxu1 %vm231_vm3, %v3855_v15  ;;  %3861 = vmatmul.msk.f32.gmra.mxu2 %vm231_vm3, %v3855_v15 }
 0x112   : > { %v4780_v22 = vpop.f32.mrf.mxu0  ;;  %v4782_v23 = vpop.f32.mrf.mxu1  ;;  %3863 = vmatmul.msk.f32.gmra.mxu3 %vm231_vm3, %v3855_v15  ;;  %v1741_v15 = vsel %vm1740_vm13, %v4258_v7, %v4259_v3  ;;  %v3905_v3 = vld [vmem:[%s5432_s1 + $0xc8] sm:$0xf] }
 0x115   : > { %3866 = vmatmul.msk.f32.vlgmr.msra.gmra.mxu0 %vm231_vm3, %v3864_v24 }
 0x116   : > { %3868 = vmatmul.msk.f32.vlgmr.msra.gmra.mxu1 %vm231_vm3, %v3864_v24  ;;  %3870 = vmatmul.msk.f32.vlgmr.msra.gmra.mxu2 %vm231_vm3, %v3864_v24 }
 0x117   : > { %1537 = vmatpush.msra.mxu1 %v1486_v25  ;;  %1560 = vmatpush.msra.mxu2 %v1487_v26 }
 0x118   : > { %1514 = vmatpush.msra.mxu0 %v1485_v28 }
 0x119   : > { %v301_v30 = vpop.f32.mrf.mxu2 }
 0x11a   : > { %v4801_v31 = vpop.f32.mrf.mxu0  ;;  %3872 = vmatmul.msk.f32.vlgmr.msra.gmra.mxu3 %vm231_vm3, %v3864_v24 }
 0x11b   : > { %v4807_v35 = vpop.f32.mrf.mxu1  ;;  %1583 = vmatpush.msra.mxu3 %v1488_v29  ;;  %v3894_v29 = vld [vmem:[%s5432_s1 + $0xb0] sm:$0xff] }
 0x11d   : > { %3867 = vmatmul.msk.f32.gmra.mxu0 %vm231_vm3, %v3865_v34  ;;  %v324_v37 = vpop.f32.mrf.mxu3 }
 0x11e   : > { %3869 = vmatmul.msk.f32.gmra.mxu1 %vm231_vm3, %v3865_v34  ;;  %3871 = vmatmul.msk.f32.gmra.mxu2 %vm231_vm3, %v3865_v34 }
 0x121   : > { %v304_v42 = vpop.f32.mrf.mxu2 }
 0x122   : > { %v4818_v44 = vpop.f32.mrf.mxu0  ;;  %3873 = vmatmul.msk.f32.gmra.mxu3 %vm231_vm3, %v3865_v34 }
 0x123   : > { %v4824_v46 = vpop.f32.mrf.mxu1 }
 0x125   : > { %3876 = vmatmul.msk.f32.vlgmr.msrb.gmra.mxu0 %vm231_vm3, %v3874_v45  ;;  %v327_v49 = vpop.f32.mrf.mxu3 }
 0x126   : > { %3878 = vmatmul.msk.f32.vlgmr.msrb.gmra.mxu1 %vm231_vm3, %v3874_v45  ;;  %3880 = vmatmul.msk.f32.vlgmr.msrb.gmra.mxu2 %vm231_vm3, %v3874_v45 }
 0x127   : > { %1665 = vmatpush.msrb.mxu1 %v1614_v47  ;;  %1688 = vmatpush.msrb.mxu2 %v1615_v48 }
 0x128   : > { %1642 = vmatpush.msrb.mxu0 %v1613_v52 }
 0x129   : > { %v418_v54 = vpop.f32.mrf.mxu2 }
 0x12a   : > { %v419_v55 = vadd.f32 %v418_v54, %v301_v30  ;;  %v4839_v56 = vpop.f32.mrf.mxu0  ;;  %3882 = vmatmul.msk.f32.vlgmr.msrb.gmra.mxu3 %vm231_vm3, %v3874_v45 }
 0x12b   : > { %v4845_v58 = vpop.f32.mrf.mxu1  ;;  %1711 = vmatpush.msrb.mxu3 %v1616_v53 }
 0x12d   : > { %3877 = vmatmul.msk.f32.gmra.mxu0 %vm231_vm3, %v3875_v57  ;;  %v441_v60 = vpop.f32.mrf.mxu3 }
 0x12e   : > { %3879 = vmatmul.msk.f32.gmra.mxu1 %vm231_vm3, %v3875_v57  ;;  %3881 = vmatmul.msk.f32.gmra.mxu2 %vm231_vm3, %v3875_v57  ;;  %v442_v62 = vadd.f32 %v441_v60, %v324_v37 }
 0x131   : > { %v421_v6 = vpop.f32.mrf.mxu2 }
 0x132   : > { %v422_v8 = vadd.f32 %v421_v6, %v304_v42  ;;  %v4856_v9 = vpop.f32.mrf.mxu0  ;;  %3883 = vmatmul.msk.f32.gmra.mxu3 %vm231_vm3, %v3875_v57  ;;  %v1986_v57 = vpop.permute.xlu1 %1985 }
 0x133   : > { %v4862_v11 = vpop.f32.mrf.mxu1 }
 0x135   : > { %3886 = vmatmul.msk.f32.vlgmr.msra.gmra.mxu0 %vm231_vm3, %v3884_v10  ;;  %v444_v32 = vpop.f32.mrf.mxu3 }
 0x136   : > { %3888 = vmatmul.msk.f32.vlgmr.msra.gmra.mxu1 %vm231_vm3, %v3884_v10  ;;  %3890 = vmatmul.msk.f32.vlgmr.msra.gmra.mxu2 %vm231_vm3, %v3884_v10  ;;  %v445_v16 = vadd.f32 %v444_v32, %v327_v49 }
 0x137   : > { %1793 = vmatpush.msra.mxu1 %v1742_v12  ;;  %1816 = vmatpush.msra.mxu2 %v1743_v13 }
 0x138   : > { %1770 = vmatpush.msra.mxu0 %v1741_v15 }
 0x139   : > { %v538_v18 = vpop.f32.mrf.mxu2 }
 0x13a   : > { %v569_v19 = vadd.f32 %v538_v18, %v419_v55  ;;  %v4875_v20 = vpop.f32.mrf.mxu0  ;;  %3892 = vmatmul.msk.f32.vlgmr.msra.gmra.mxu3 %vm231_vm3, %v3884_v10 }
 0x13b   : > { %v4881_v24 = vpop.f32.mrf.mxu1  ;;  %1839 = vmatpush.msra.mxu3 %v1744_v17 }
 0x13d   : > { %3887 = vmatmul.msk.f32.gmra.mxu0 %vm231_vm3, %v3885_v21  ;;  %v561_v25 = vpop.f32.mrf.mxu3 }
 0x13e   : > { %3889 = vmatmul.msk.f32.gmra.mxu1 %vm231_vm3, %v3885_v21  ;;  %3891 = vmatmul.msk.f32.gmra.mxu2 %vm231_vm3, %v3885_v21  ;;  %v570_v33 = vadd.f32 %v561_v25, %v442_v62 }
 0x141   : > { %v541_v26 = vpop.f32.mrf.mxu2 }
 0x142   : > { %v573_v27 = vadd.f32 %v541_v26, %v422_v8  ;;  %v4888_v28 = vpop.f32.mrf.mxu0  ;;  %3893 = vmatmul.msk.f32.gmra.mxu3 %vm231_vm3, %v3885_v21 }
 0x143   : > { %v4894_v30 = vpop.f32.mrf.mxu1 }
 0x145   : > { %3896 = vmatmul.msk.f32.vlgmr.msrb.gmra.mxu0 %vm231_vm3, %v3894_v29  ;;  %v564_v34 = vpop.f32.mrf.mxu3 }
 0x146   : > { %3898 = vmatmul.msk.f32.vlgmr.msrb.gmra.mxu1 %vm231_vm3, %v3894_v29  ;;  %3900 = vmatmul.msk.f32.vlgmr.msrb.gmra.mxu2 %vm231_vm3, %v3894_v29  ;;  %v574_v36 = vadd.f32 %v564_v34, %v445_v16 }
 0x147   : > { %1925 = vmatpush.msrb.mxu2 %v4575_v1  ;;  %1879 = vmatpush.msrb.mxu0 %v4581_v4  ;;  %v4262_v1 = vpop.permute.xlu0 %4261  ;;  %v4267_v4 = vpop.permute.xlu2 %4266 }
 0x148   : > { %1902 = vmatpush.msrb.mxu1 %v4572_v0  ;;  %v4264_v42 = vunpack.i.h.bf16 %v4262_v1  ;;  %v4263_v43 = vunpack.i.l.bf16 %v4262_v1  ;;  %v4269_v45 = vunpack.i.h.bf16 %v4267_v4  ;;  %v4268_v48 = vunpack.i.l.bf16 %v4267_v4  ;;  %v3915_v1 = vld [vmem:[%s5432_s1 + $0xd8] sm:$0xf] }
 0x149   : > { %v666_v37 = vpop.f32.mrf.mxu2 }
 0x14a   : > { %v697_v38 = vadd.f32 %v666_v37, %v569_v19  ;;  %v4904_v39 = vpop.f32.mrf.mxu0  ;;  %3902 = vmatmul.msk.f32.vlgmr.msrb.gmra.mxu3 %vm231_vm3, %v3894_v29  ;;  %v1989_v53 = vsel %vm1987_vm14, %v4269_v45, %v4263_v43  ;;  %v1990_v54 = vsel %vm1987_vm14, %v4263_v43, %v4264_v42  ;;  %v1988_v59 = vsel %vm1987_vm14, %v4268_v48, %v4269_v45  ;;  %v3914_v19 = vld [vmem:[%s5432_s1 + $0xd0] sm:$0xff] }
 0x14b   : > { %v4910_v41 = vpop.f32.mrf.mxu1  ;;  %1948 = vmatpush.msrb.mxu3 %v4584_v5  ;;  %v3904_v5 = vld [vmem:[%s5432_s1 + $0xc0] sm:$0xff]  ;;  %v1991_v61 = vsel %vm1987_vm14, %v4264_v42, %v1986_v57 }
 0x14d   : > { %3897 = vmatmul.msk.f32.gmra.mxu0 %vm231_vm3, %v3895_v40  ;;  %v689_v0 = vpop.f32.mrf.mxu3 }
 0x14e   : > { %3899 = vmatmul.msk.f32.gmra.mxu1 %vm231_vm3, %v3895_v40  ;;  %3901 = vmatmul.msk.f32.gmra.mxu2 %vm231_vm3, %v3895_v40  ;;  %v698_v51 = vadd.f32 %v689_v0, %v570_v33 }
 0x14f   : > { %v4272_v7 = vpop.permute.xlu0 %4271  ;;  %v4277_v10 = vpop.permute.xlu2 %4276 }
 0x150   : > { %v4274_v13 = vunpack.i.h.bf16 %v4272_v7  ;;  %v4273_v32 = vunpack.i.l.bf16 %v4272_v7  ;;  %v4279_v14 = vunpack.i.h.bf16 %v4277_v10  ;;  %v4278_v16 = vunpack.i.l.bf16 %v4277_v10 }
 0x151   : > { %v669_v47 = vpop.f32.mrf.mxu2 }
 0x152   : > { %v701_v49 = vadd.f32 %v669_v47, %v573_v27  ;;  %v4916_v50 = vpop.f32.mrf.mxu0  ;;  %3903 = vmatmul.msk.f32.gmra.mxu3 %vm231_vm3, %v3895_v40  ;;  %v2117_v25 = vsel %vm2115_vm15, %v4279_v14, %v4273_v32  ;;  %v2118_v33 = vsel %vm2115_vm15, %v4273_v32, %v4274_v13  ;;  %v2114_v27 = vpop.permute.xlu1 %2113  ;;  %v2116_v29 = vsel %vm2115_vm15, %v4278_v16, %v4279_v14 }
 0x153   : > { %v4922_v52 = vpop.f32.mrf.mxu1 }
 0x155   : > { %3906 = vmatmul.msk.f32.vlgmr.msra.gmra.mxu0 %vm231_vm3, %v3904_v5  ;;  %v692_v55 = vpop.f32.mrf.mxu3 }
 0x156   : > { %3908 = vmatmul.msk.f32.vlgmr.msra.gmra.mxu1 %vm231_vm3, %v3904_v5  ;;  %3910 = vmatmul.msk.f32.vlgmr.msra.gmra.mxu2 %vm231_vm3, %v3904_v5  ;;  %v702_v60 = vadd.f32 %v692_v55, %v574_v36  ;;  %v2119_v36 = vsel %vm2115_vm15, %v4274_v13, %v2114_v27  ;;  %v3924_v55 = vld [vmem:[%s5432_s1 + $0xe0] sm:$0xff]  ;;  %v3925_v13 = vld [vmem:[%s5432_s1 + $0xe8] sm:$0xf] }
 0x157   : > { %2040 = vmatpush.msra.mxu1 %v1989_v53  ;;  %2063 = vmatpush.msra.mxu2 %v1990_v54  ;;  %v4282_v4 = vpop.permute.xlu0 %4281  ;;  %v4287_v42 = vpop.permute.xlu2 %4286 }
 0x158   : > { %2017 = vmatpush.msra.mxu0 %v1988_v59  ;;  %v4284_v45 = vunpack.i.h.bf16 %v4282_v4  ;;  %v4283_v47 = vunpack.i.l.bf16 %v4282_v4  ;;  %v4289_v48 = vunpack.i.h.bf16 %v4287_v42 }
 0x159   : > { %v794_v62 = vpop.f32.mrf.mxu2 }
 0x15a   : > { %v825_v63 = vadd.f32 %v794_v62, %v697_v38  ;;  %v4931_v2 = vpop.f32.mrf.mxu0  ;;  %3912 = vmatmul.msk.f32.vlgmr.msra.gmra.mxu3 %vm231_vm3, %v3904_v5  ;;  %v4288_v5 = vunpack.i.l.bf16 %v4287_v42  ;;  %v2245_v59 = vsel %vm2243_vm0, %v4289_v48, %v4283_v47  ;;  %v2242_v62 = vpop.permute.xlu1 %2241 }
 0x15b   : > { %v4937_v6 = vpop.f32.mrf.mxu1  ;;  %2086 = vmatpush.msra.mxu3 %v1991_v61  ;;  %v2247_v7 = vsel %vm2243_vm0, %v4284_v45, %v2242_v62 }
 0x15d   : > { %3907 = vmatmul.msk.f32.gmra.mxu0 %vm231_vm3, %v3905_v3  ;;  %v817_v8 = vpop.f32.mrf.mxu3 }
 0x15e   : > { %3909 = vmatmul.msk.f32.gmra.mxu1 %vm231_vm3, %v3905_v3  ;;  %3911 = vmatmul.msk.f32.gmra.mxu2 %vm231_vm3, %v3905_v3  ;;  %v826_v12 = vadd.f32 %v817_v8, %v698_v51 }
 0x15f   : > { %v4292_v14 = vpop.permute.xlu0 %4291  ;;  %v4297_v16 = vpop.permute.xlu2 %4296 }
 0x160   : > { %v4298_v27 = vunpack.i.l.bf16 %v4297_v16 }
 0x161   : > { %v797_v15 = vpop.f32.mrf.mxu2 }
 0x162   : > { %v829_v17 = vadd.f32 %v797_v15, %v701_v49  ;;  %v4942_v18 = vpop.f32.mrf.mxu0  ;;  %3913 = vmatmul.msk.f32.gmra.mxu3 %vm231_vm3, %v3905_v3 }
 0x163   : > { %v4948_v21 = vpop.f32.mrf.mxu1 }
 0x165   : > { %3916 = vmatmul.msk.f32.vlgmr.msrb.gmra.mxu0 %vm231_vm3, %v3914_v19  ;;  %v820_v26 = vpop.f32.mrf.mxu3 }
 0x166   : > { %3918 = vmatmul.msk.f32.vlgmr.msrb.gmra.mxu1 %vm231_vm3, %v3914_v19  ;;  %3920 = vmatmul.msk.f32.vlgmr.msrb.gmra.mxu2 %vm231_vm3, %v3914_v19  ;;  %v830_v34 = vadd.f32 %v820_v26, %v702_v60  ;;  %v2246_v60 = vsel %vm2243_vm0, %v4283_v47, %v4284_v45 }
 0x167   : > { %2168 = vmatpush.msrb.mxu1 %v2117_v25  ;;  %2191 = vmatpush.msrb.mxu2 %v2118_v33  ;;  %v4293_v25 = vunpack.i.l.bf16 %v4292_v14  ;;  %v4299_v33 = vunpack.i.h.bf16 %v4297_v16 }
 0x168   : > { %2145 = vmatpush.msrb.mxu0 %v2116_v29 }
 0x169   : > { %v922_v37 = vpop.f32.mrf.mxu2  ;;  %v2372_v42 = vsel %vm2371_vm1, %v4298_v27, %v4299_v33  ;;  %v4393_v27 = vld [vmem:[%s4569_s5 + $0x18] sm:$0xff] }
 0x16a   : > { %v953_v38 = vadd.f32 %v922_v37, %v825_v63  ;;  %v4957_v40 = vpop.f32.mrf.mxu0  ;;  %3922 = vmatmul.msk.f32.vlgmr.msrb.gmra.mxu3 %vm231_vm3, %v3914_v19  ;;  %v2244_v63 = vsel %vm2243_vm0, %v4288_v5, %v4289_v48  ;;  %v4294_v19 = vunpack.i.h.bf16 %v4292_v14  ;;  %v3935_v5 = vld [vmem:[%s5432_s1 + $0xf8] sm:$0xf]  ;;  %v3944_v14 = vld [vmem:[%s5432_s1 + $0x100] sm:$0xff] }
 0x16b   : > { %v4963_v0 = vpop.f32.mrf.mxu1  ;;  %2214 = vmatpush.msrb.mxu3 %v2119_v36  ;;  %v3934_v36 = vld [vmem:[%s5432_s1 + $0xf0] sm:$0xff] }
 0x16d   : > { %3917 = vmatmul.msk.f32.gmra.mxu0 %vm231_vm3, %v3915_v1  ;;  %v945_v51 = vpop.f32.mrf.mxu3 }
 0x16e   : > { %3919 = vmatmul.msk.f32.gmra.mxu1 %vm231_vm3, %v3915_v1  ;;  %3921 = vmatmul.msk.f32.gmra.mxu2 %vm231_vm3, %v3915_v1  ;;  %v954_v43 = vadd.f32 %v945_v51, %v826_v12  ;;  %v2370_v51 = vpop.permute.xlu1 %2369 }
 0x16f   : > { %v2375_v45 = vsel %vm2371_vm1, %v4294_v19, %v2370_v51 }
 0x171   : > { %v925_v49 = vpop.f32.mrf.mxu2 }
 0x172   : > { %v957_v53 = vadd.f32 %v925_v49, %v829_v17  ;;  %v4968_v54 = vpop.f32.mrf.mxu0  ;;  %3923 = vmatmul.msk.f32.gmra.mxu3 %vm231_vm3, %v3915_v1  ;;  %v2374_v1 = vsel %vm2371_vm1, %v4293_v25, %v4294_v19 }
 0x173   : > { %v4974_v57 = vpop.f32.mrf.mxu1 }
 0x175   : > { %3926 = vmatmul.msk.f32.vlgmr.msra.gmra.mxu0 %vm231_vm3, %v3924_v55  ;;  %v948_v61 = vpop.f32.mrf.mxu3 }
 0x176   : > { %3928 = vmatmul.msk.f32.vlgmr.msra.gmra.mxu1 %vm231_vm3, %v3924_v55  ;;  %3930 = vmatmul.msk.f32.vlgmr.msra.gmra.mxu2 %vm231_vm3, %v3924_v55  ;;  %v958_v3 = vadd.f32 %v948_v61, %v830_v34 }
 0x177   : > { %2296 = vmatpush.msra.mxu1 %v2245_v59  ;;  %2319 = vmatpush.msra.mxu2 %v2246_v60  ;;  %v4307_v60 = vpop.permute.xlu2 %4306 }
 0x178   : > { %2273 = vmatpush.msra.mxu0 %v2244_v63 }
 0x179   : > { %v1050_v8 = vpop.f32.mrf.mxu2 }
 0x17a   : > { %v1081_v10 = vadd.f32 %v1050_v8, %v953_v38  ;;  %v4983_v12 = vpop.f32.mrf.mxu0  ;;  %3932 = vmatmul.msk.f32.vlgmr.msra.gmra.mxu3 %vm231_vm3, %v3924_v55  ;;  %v2373_v38 = vsel %vm2371_vm1, %v4299_v33, %v4293_v25  ;;  %v4302_v55 = vpop.permute.xlu0 %4301  ;;  %v4308_v8 = vunpack.i.l.bf16 %v4307_v60 }
 0x17b   : > { %v4989_v32 = vpop.f32.mrf.mxu1  ;;  %2342 = vmatpush.msra.mxu3 %v2247_v7  ;;  %v4304_v62 = vunpack.i.h.bf16 %v4302_v55  ;;  %v4303_v63 = vunpack.i.l.bf16 %v4302_v55  ;;  %v2498_v25 = vpop.permute.xlu1 %2497 }
 0x17d   : > { %3927 = vmatmul.msk.f32.gmra.mxu0 %vm231_vm3, %v3925_v13  ;;  %v1073_v15 = vpop.f32.mrf.mxu3 }
 0x17e   : > { %3929 = vmatmul.msk.f32.gmra.mxu1 %vm231_vm3, %v3925_v13  ;;  %3931 = vmatmul.msk.f32.gmra.mxu2 %vm231_vm3, %v3925_v13  ;;  %v1082_v17 = vadd.f32 %v1073_v15, %v954_v43 }
 0x181   : > { %v1053_v26 = vpop.f32.mrf.mxu2 }
 0x182   : > { %v1085_v29 = vadd.f32 %v1053_v26, %v957_v53  ;;  %v4994_v34 = vpop.f32.mrf.mxu0  ;;  %3933 = vmatmul.msk.f32.gmra.mxu3 %vm231_vm3, %v3925_v13 }
 0x183   : > { %v5000_v37 = vpop.f32.mrf.mxu1 }
 0x185   : > { %3936 = vmatmul.msk.f32.vlgmr.msrb.gmra.mxu0 %vm231_vm3, %v3934_v36  ;;  %v1076_v4 = vpop.f32.mrf.mxu3 }
 0x186   : > { %3938 = vmatmul.msk.f32.vlgmr.msrb.gmra.mxu1 %vm231_vm3, %v3934_v36  ;;  %3940 = vmatmul.msk.f32.vlgmr.msrb.gmra.mxu2 %vm231_vm3, %v3934_v36  ;;  %v1086_v43 = vadd.f32 %v1076_v4, %v958_v3  ;;  %v4309_v3 = vunpack.i.h.bf16 %v4307_v60 }
 0x187   : > { %2424 = vmatpush.msrb.mxu1 %v2373_v38  ;;  %2447 = vmatpush.msrb.mxu2 %v2374_v1  ;;  %v2503_v38 = vsel %vm2499_vm2, %v4304_v62, %v2498_v25 }
 0x188   : > { %2401 = vmatpush.msrb.mxu0 %v2372_v42  ;;  %v2501_v16 = vsel %vm2499_vm2, %v4309_v3, %v4303_v63  ;;  %v2500_v33 = vsel %vm2499_vm2, %v4308_v8, %v4309_v3  ;;  %v3945_v42 = vld [vmem:[%s5432_s1 + $0x108] sm:$0xf]  ;;  %v3954_v8 = vld [vmem:[%s5432_s1 + $0x110] sm:$0xff] }
 0x189   : > { %v1178_v47 = vpop.f32.mrf.mxu2 }
 0x18a   : > { %v1209_v48 = vadd.f32 %v1178_v47, %v1081_v10  ;;  %v5009_v49 = vpop.f32.mrf.mxu0  ;;  %3942 = vmatmul.msk.f32.vlgmr.msrb.gmra.mxu3 %vm231_vm3, %v3934_v36 }
 0x18b   : > { %v5015_v53 = vpop.f32.mrf.mxu1  ;;  %2470 = vmatpush.msrb.mxu3 %v2375_v45  ;;  %v4312_v45 = vpop.permute.xlu0 %4311 }
 0x18c   : > { %v4314_v55 = vunpack.i.h.bf16 %v4312_v45 }
 0x18d   : > { %3937 = vmatmul.msk.f32.gmra.mxu0 %vm231_vm3, %v3935_v5  ;;  %v1201_v59 = vpop.f32.mrf.mxu3 }
 0x18e   : > { %3939 = vmatmul.msk.f32.gmra.mxu1 %vm231_vm3, %v3935_v5  ;;  %3941 = vmatmul.msk.f32.gmra.mxu2 %vm231_vm3, %v3935_v5  ;;  %v1210_v61 = vadd.f32 %v1201_v59, %v1082_v17  ;;  %v2502_v17 = vsel %vm2499_vm2, %v4303_v63, %v4304_v62  ;;  %v4313_v59 = vunpack.i.l.bf16 %v4312_v45 }
 0x191   : > { %v1181_v7 = vpop.f32.mrf.mxu2 }
 0x192   : > { %v1213_v10 = vadd.f32 %v1181_v7, %v1085_v29  ;;  %v5020_v13 = vpop.f32.mrf.mxu0  ;;  %3943 = vmatmul.msk.f32.gmra.mxu3 %vm231_vm3, %v3935_v5  ;;  %v4394_v29 = vld [vmem:[%s4569_s5 + $0x20] sm:$0xff]  ;;  %v4317_v5 = vpop.permute.xlu2 %4316 }
 0x193   : > { %v5026_v15 = vpop.f32.mrf.mxu1  ;;  %v4380_v36 = vpack.i.bf16 %v4394_v29, %v4393_v27  ;;  %v4319_v60 = vunpack.i.h.bf16 %v4317_v5  ;;  %v4318_v63 = vunpack.i.l.bf16 %v4317_v5  ;;  %v4396_v5 = vld [vmem:[%s4569_s5 + $0x8] sm:$0xff] }
 0x195   : > { %3946 = vmatmul.msk.f32.vlgmr.msra.gmra.mxu0 %vm231_vm3, %v3944_v14  ;;  %v1204_v19 = vpop.f32.mrf.mxu3  ;;  %4381 = vrot.lane.b32.xlu0 %v4380_v36, %s4486_s9 }
 0x196   : > { %3948 = vmatmul.msk.f32.vlgmr.msra.gmra.mxu1 %vm231_vm3, %v3944_v14  ;;  %3950 = vmatmul.msk.f32.vlgmr.msra.gmra.mxu2 %vm231_vm3, %v3944_v14  ;;  %v1214_v26 = vadd.f32 %v1204_v19, %v1086_v43  ;;  %v2626_v19 = vpop.permute.xlu1 %2625 }
 0x197   : > { %2552 = vmatpush.msra.mxu1 %v2501_v16  ;;  %2575 = vmatpush.msra.mxu2 %v2502_v17  ;;  %v2629_v16 = vsel %vm2627_vm4, %v4319_v60, %v4313_v59 }
 0x198   : > { %2529 = vmatpush.msra.mxu0 %v2500_v33  ;;  %v2631_v33 = vsel %vm2627_vm4, %v4314_v55, %v2626_v19 }
 0x199   : > { %v1306_v1 = vpop.f32.mrf.mxu2 }
 0x19a   : > { %v1337_v4 = vadd.f32 %v1306_v1, %v1209_v48  ;;  %v5038_v51 = vpop.f32.mrf.mxu0  ;;  %3952 = vmatmul.msk.f32.vlgmr.msra.gmra.mxu3 %vm231_vm3, %v3944_v14  ;;  %v4327_v45 = vpop.permute.xlu2 %4326 }
 0x19b   : > { %v5044_v43 = vpop.f32.mrf.mxu1  ;;  %2598 = vmatpush.msra.mxu3 %v2503_v38  ;;  %v3955_v38 = vld [vmem:[%s5432_s1 + $0x118] sm:$0xf] }
 0x19d   : > { %3947 = vmatmul.msk.f32.gmra.mxu0 %vm231_vm3, %v3945_v42  ;;  %v1329_v47 = vpop.f32.mrf.mxu3 }
 0x19e   : > { %3949 = vmatmul.msk.f32.gmra.mxu1 %vm231_vm3, %v3945_v42  ;;  %3951 = vmatmul.msk.f32.gmra.mxu2 %vm231_vm3, %v3945_v42  ;;  %v1338_v48 = vadd.f32 %v1329_v47, %v1210_v61  ;;  %v2630_v61 = vsel %vm2627_vm4, %v4313_v59, %v4314_v55  ;;  %v4395_v47 = vld [vmem:[%s4569_s5 + $0x10] sm:$0xff]  ;;  %s4411_s5 = sshra.s32 %s3718_s10, 4  ;;  %s4412_s5 = int_to_ptr.hbm [resolvable:$true] %s4411_s5 }
 0x19f   : > { %v4385_v55 = vpack.i.bf16 %v4395_v47, %v4396_v5  ;;  %v3965_v5 = vld [vmem:[%s5432_s1 + $0x128] sm:$0xf]  ;;  %p4418_p0 = scmp.lt.s32.totalorder %s4412_s5, %s5435_s4 }
 0x1a1   : > { %v1309_v62 = vpop.f32.mrf.mxu2  ;;  %4386 = vrot.lane.b32.xlu2 %v4385_v55, %s4486_s9  ;;  %s4413_s9 = scalar_lea.hbm %s4412_s5, 64 }
 0x1a2   : > { %v1341_v3 = vadd.f32 %v1309_v62, %v1213_v10  ;;  %v5049_v7 = vpop.f32.mrf.mxu0  ;;  %3953 = vmatmul.msk.f32.gmra.mxu3 %vm231_vm3, %v3945_v42  ;;  %v2628_v10 = vsel %vm2627_vm4, %v4318_v63, %v4319_v60  ;;  %v4329_v62 = vunpack.i.h.bf16 %v4327_v45  ;;  %p4414_p11 = scmp.ne.s32.totalorder %s4412_s5, %s4413_s9  ;;  %p4419_p1 = scmp.lt.s32.totalorder %s4417_s14, %s4413_s9 }
 0x1a3   : > { %v5055_v14 = vpop.f32.mrf.mxu1 }
 0x1a4   : > { %p4415_p12 = pnand %p4414_p11, %p4554_p5  ;;  %p4420_p2 = por %p4419_p1, %p4418_p0 }
 0x1a5   : > { %3956 = vmatmul.msk.f32.vlgmr.msrb.gmra.mxu0 %vm231_vm3, %v3954_v8  ;;  %v1332_v17 = vpop.f32.mrf.mxu3 }
 0x1a6   : > { %3958 = vmatmul.msk.f32.vlgmr.msrb.gmra.mxu1 %vm231_vm3, %v3954_v8  ;;  %3960 = vmatmul.msk.f32.vlgmr.msrb.gmra.mxu2 %vm231_vm3, %v3954_v8  ;;  %v1342_v25 = vadd.f32 %v1332_v17, %v1214_v26  ;;  %v4322_v26 = vpop.permute.xlu0 %4321  ;;  %p4416_p13 = pneg %p4415_p12 }
 0x1a7   : > { %2680 = vmatpush.msrb.mxu1 %v2629_v16  ;;  %2703 = vmatpush.msrb.mxu2 %v2630_v61  ;;  %v4324_v59 = vunpack.i.h.bf16 %v4322_v26  ;;  %v4323_v60 = vunpack.i.l.bf16 %v4322_v26 }
 0x1a8   : > { %2657 = vmatpush.msrb.mxu0 %v2628_v10  ;;  %p4421_p3 = pnand %p4420_p2, %p4416_p13 }
 0x1a9   : > { %v1434_v27 = vpop.f32.mrf.mxu2  ;;  %v2757_v19 = vsel %vm2755_vm5, %v4329_v62, %v4323_v60  ;;  %v2758_v10 = vsel %vm2755_vm5, %v4323_v60, %v4324_v59 }
 0x1aa   : > { %v1465_v29 = vadd.f32 %v1434_v27, %v1337_v4  ;;  %v5064_v36 = vpop.f32.mrf.mxu0  ;;  %3962 = vmatmul.msk.f32.vlgmr.msrb.gmra.mxu3 %vm231_vm3, %v3954_v8  ;;  %v4328_v8 = vunpack.i.l.bf16 %v4327_v45  ;;  %v2754_v27 = vpop.permute.xlu1 %2753 }
 0x1ab   : > { %5438 = vst [vmem:[#allocation5_spill] sm:$0xff] %v5064_v36  ;;  %v5070_v1 = vpop.f32.mrf.mxu1  ;;  %2726 = vmatpush.msrb.mxu3 %v2631_v33  ;;  %v2759_v26 = vsel %vm2755_vm5, %v4324_v59, %v2754_v27  ;;  %v3974_v27 = vld [vmem:[%s5432_s1 + $0x130] sm:$0xff] }
 0x1ac   : > { %5439 = vst [vmem:[#allocation6_spill] sm:$0xff] %v5070_v1 }
 0x1ad   : > { %3957 = vmatmul.msk.f32.gmra.mxu0 %vm231_vm3, %v3955_v38  ;;  %v1457_v42 = vpop.f32.mrf.mxu3 }
 0x1ae   : > { %3959 = vmatmul.msk.f32.gmra.mxu1 %vm231_vm3, %v3955_v38  ;;  %3961 = vmatmul.msk.f32.gmra.mxu2 %vm231_vm3, %v3955_v38  ;;  %v1466_v4 = vadd.f32 %v1457_v42, %v1338_v48  ;;  %v3964_v48 = vld [vmem:[%s5432_s1 + $0x120] sm:$0xff]  ;;  %v4332_v60 = vpop.permute.xlu0 %4331 }
 0x1af   : > { %v4334_v59 = vunpack.i.h.bf16 %v4332_v60 }
 0x1b1   : > { %v1437_v63 = vpop.f32.mrf.mxu2 }
 0x1b2   : > { %v1469_v16 = vadd.f32 %v1437_v63, %v1341_v3  ;;  %v5078_v61 = vpop.f32.mrf.mxu0  ;;  %3963 = vmatmul.msk.f32.gmra.mxu3 %vm231_vm3, %v3955_v38  ;;  %v2756_v3 = vsel %vm2755_vm5, %v4328_v8, %v4329_v62  ;;  %v4337_v62 = vpop.permute.xlu2 %4336  ;;  %v4333_v63 = vunpack.i.l.bf16 %v4332_v60 }
 0x1b3   : > { %v5084_v17 = vpop.f32.mrf.mxu1  ;;  %v4339_v8 = vunpack.i.h.bf16 %v4337_v62  ;;  %v2882_v60 = vpop.permute.xlu1 %2881 }
 0x1b5   : > { %3966 = vmatmul.msk.f32.vlgmr.msra.gmra.mxu0 %vm231_vm3, %v3964_v48  ;;  %v1460_v33 = vpop.f32.mrf.mxu3 }
 0x1b6   : > { %3968 = vmatmul.msk.f32.vlgmr.msra.gmra.mxu1 %vm231_vm3, %v3964_v48  ;;  %3970 = vmatmul.msk.f32.vlgmr.msra.gmra.mxu2 %vm231_vm3, %v3964_v48  ;;  %v1470_v38 = vadd.f32 %v1460_v33, %v1342_v25 }
 0x1b7   : > { %2808 = vmatpush.msra.mxu1 %v2757_v19  ;;  %2831 = vmatpush.msra.mxu2 %v2758_v10  ;;  %v4338_v19 = vunpack.i.l.bf16 %v4337_v62 }
 0x1b8   : > { %2785 = vmatpush.msra.mxu0 %v2756_v3 }
 0x1b9   : > { %v1562_v42 = vpop.f32.mrf.mxu2 }
 0x1ba   : > { %v1593_v45 = vadd.f32 %v1562_v42, %v1465_v29  ;;  %v5093_v47 = vpop.f32.mrf.mxu0  ;;  %3972 = vmatmul.msk.f32.vlgmr.msra.gmra.mxu3 %vm231_vm3, %v3964_v48 }
 0x1bb   : > { %5440 = vst [vmem:[#allocation7_spill] sm:$0xff] %v5093_v47  ;;  %v5099_v55 = vpop.f32.mrf.mxu1  ;;  %2854 = vmatpush.msra.mxu3 %v2759_v26  ;;  %v2885_v26 = vsel %vm2883_vm6, %v4339_v8, %v4333_v63 }
 0x1bc   : > { %5441 = vst [vmem:[#allocation8_spill] sm:$0xff] %v5099_v55 }
 0x1bd   : > { %3967 = vmatmul.msk.f32.gmra.mxu0 %vm231_vm3, %v3965_v5  ;;  %v1585_v25 = vpop.f32.mrf.mxu3 }
 0x1be   : > { %3969 = vmatmul.msk.f32.gmra.mxu1 %vm231_vm3, %v3965_v5  ;;  %3971 = vmatmul.msk.f32.gmra.mxu2 %vm231_vm3, %v3965_v5  ;;  %v1594_v29 = vadd.f32 %v1585_v25, %v1466_v4  ;;  %v2886_v4 = vsel %vm2883_vm6, %v4333_v63, %v4334_v59  ;;  %v2887_v25 = vsel %vm2883_vm6, %v4334_v59, %v2882_v60  ;;  %v3975_v63 = vld [vmem:[%s5432_s1 + $0x138] sm:$0xf] }
 0x1c1   : > { %v1565_v48 = vpop.f32.mrf.mxu2 }
 0x1c2   : > { %v1597_v10 = vadd.f32 %v1565_v48, %v1469_v16  ;;  %v5104_v33 = vpop.f32.mrf.mxu0  ;;  %3973 = vmatmul.msk.f32.gmra.mxu3 %vm231_vm3, %v3965_v5  ;;  %v2884_v16 = vsel %vm2883_vm6, %v4338_v19, %v4339_v8  ;;  %v4342_v19 = vpop.permute.xlu0 %4341 }
 0x1c3   : > { %v5110_v3 = vpop.f32.mrf.mxu1  ;;  %v4344_v59 = vunpack.i.h.bf16 %v4342_v19 }
 0x1c5   : > { %3976 = vmatmul.msk.f32.vlgmr.msrb.gmra.mxu0 %vm231_vm3, %v3974_v27  ;;  %v1588_v42 = vpop.f32.mrf.mxu3 }
 0x1c6   : > { %3978 = vmatmul.msk.f32.vlgmr.msrb.gmra.mxu1 %vm231_vm3, %v3974_v27  ;;  %3980 = vmatmul.msk.f32.vlgmr.msrb.gmra.mxu2 %vm231_vm3, %v3974_v27  ;;  %v1598_v5 = vadd.f32 %v1588_v42, %v1470_v38 }
 0x1c7   : > { %2936 = vmatpush.msrb.mxu1 %v2885_v26  ;;  %2959 = vmatpush.msrb.mxu2 %v2886_v4  ;;  %v4347_v26 = vpop.permute.xlu2 %4346  ;;  %v4343_v4 = vunpack.i.l.bf16 %v4342_v19 }
 0x1c8   : > { %2913 = vmatpush.msrb.mxu0 %v2884_v16  ;;  %v4348_v60 = vunpack.i.l.bf16 %v4347_v26 }
 0x1c9   : > { %v1690_v62 = vpop.f32.mrf.mxu2 }
 0x1ca   : > { %v1721_v48 = vadd.f32 %v1690_v62, %v1593_v45  ;;  %v5119_v55 = vpop.f32.mrf.mxu0  ;;  %3982 = vmatmul.msk.f32.vlgmr.msrb.gmra.mxu3 %vm231_vm3, %v3974_v27  ;;  %v4349_v27 = vunpack.i.h.bf16 %v4347_v26 }
 0x1cb   : > { %5442 = vst [vmem:[#allocation9_spill] sm:$0xff] %v5119_v55  ;;  %v5125_v8 = vpop.f32.mrf.mxu1  ;;  %2982 = vmatpush.msrb.mxu3 %v2887_v25  ;;  %v3984_v25 = vld [vmem:[%s5432_s1 + $0x140] sm:$0xff] }
 0x1cc   : > { %5443 = vst [vmem:[#allocation10_spill] sm:$0xff] %v5125_v8  ;;  %v3013_v55 = vsel %vm3011_vm7, %v4349_v27, %v4343_v4 }
 0x1cd   : > { %3977 = vmatmul.msk.f32.gmra.mxu0 %vm231_vm3, %v3975_v63  ;;  %v1713_v38 = vpop.f32.mrf.mxu3 }
 0x1ce   : > { %3979 = vmatmul.msk.f32.gmra.mxu1 %vm231_vm3, %v3975_v63  ;;  %3981 = vmatmul.msk.f32.gmra.mxu2 %vm231_vm3, %v3975_v63  ;;  %v1722_v45 = vadd.f32 %v1713_v38, %v1594_v29  ;;  %v3014_v29 = vsel %vm3011_vm7, %v4343_v4, %v4344_v59  ;;  %v3010_v38 = vpop.permute.xlu1 %3009  ;;  %v3985_v4 = vld [vmem:[%s5432_s1 + $0x148] sm:$0xf] }
 0x1cf   : > { %v3015_v26 = vsel %vm3011_vm7, %v4344_v59, %v3010_v38 }
 0x1d1   : > { %v1693_v42 = vpop.f32.mrf.mxu2 }
 0x1d2   : > { %v1725_v16 = vadd.f32 %v1693_v42, %v1597_v10  ;;  %v5130_v62 = vpop.f32.mrf.mxu0  ;;  %3983 = vmatmul.msk.f32.gmra.mxu3 %vm231_vm3, %v3975_v63  ;;  %v3012_v10 = vsel %vm3011_vm7, %v4348_v60, %v4349_v27  ;;  %v4352_v60 = vpop.permute.xlu0 %4351 }
 0x1d3   : > { %v5136_v8 = vpop.f32.mrf.mxu1  ;;  %v4354_v59 = vunpack.i.h.bf16 %v4352_v60 }
 0x1d5   : > { %3986 = vmatmul.msk.f32.vlgmr.msra.gmra.mxu0 %vm231_vm3, %v3984_v25  ;;  %v1716_v19 = vpop.f32.mrf.mxu3 }
 0x1d6   : > { %3988 = vmatmul.msk.f32.vlgmr.msra.gmra.mxu1 %vm231_vm3, %v3984_v25  ;;  %3990 = vmatmul.msk.f32.vlgmr.msra.gmra.mxu2 %vm231_vm3, %v3984_v25  ;;  %v1726_v63 = vadd.f32 %v1716_v19, %v1598_v5  ;;  %v4357_v5 = vpop.permute.xlu2 %4356 }
 0x1d7   : > { %3064 = vmatpush.msra.mxu1 %v3013_v55  ;;  %3087 = vmatpush.msra.mxu2 %v3014_v29  ;;  %v4353_v29 = vunpack.i.l.bf16 %v4352_v60  ;;  %v4358_v38 = vunpack.i.l.bf16 %v4357_v5 }
 0x1d8   : > { %3041 = vmatpush.msra.mxu0 %v3012_v10 }
 0x1d9   : > { %v1818_v42 = vpop.f32.mrf.mxu2 }
 0x1da   : > { %v1849_v47 = vadd.f32 %v1818_v42, %v1721_v48  ;;  %v5145_v1 = vpop.f32.mrf.mxu0  ;;  %3992 = vmatmul.msk.f32.vlgmr.msra.gmra.mxu3 %vm231_vm3, %v3984_v25  ;;  %v4359_v25 = vunpack.i.h.bf16 %v4357_v5  ;;  %v373_v5 = vadd.f32 %v4818_v44, %v4780_v22  ;;  %v3995_v22 = vld [vmem:[%s5432_s1 + $0x158] sm:$0xf] }
 0x1db   : > { %5444 = vst [vmem:[#allocation11_spill] sm:$0xff] %v5145_v1  ;;  %v5151_v27 = vpop.f32.mrf.mxu1  ;;  %3110 = vmatpush.msra.mxu3 %v3015_v26  ;;  %v3994_v26 = vld [vmem:[%s5432_s1 + $0x150] sm:$0xff] }
 0x1dc   : > { %5445 = vst [vmem:[#allocation12_spill] sm:$0xff] %v5151_v27  ;;  %v3141_v1 = vsel %vm3139_vm8, %v4359_v25, %v4353_v29 }
 0x1dd   : > { %3987 = vmatmul.msk.f32.gmra.mxu0 %vm231_vm3, %v3985_v4  ;;  %v1841_v55 = vpop.f32.mrf.mxu3 }
 0x1de   : > { %3989 = vmatmul.msk.f32.gmra.mxu1 %vm231_vm3, %v3985_v4  ;;  %3991 = vmatmul.msk.f32.gmra.mxu2 %vm231_vm3, %v3985_v4  ;;  %v1850_v48 = vadd.f32 %v1841_v55, %v1722_v45  ;;  %v3142_v45 = vsel %vm3139_vm8, %v4353_v29, %v4354_v59  ;;  %v3138_v55 = vpop.permute.xlu1 %3137 }
 0x1df   : > { %v3143_v29 = vsel %vm3139_vm8, %v4354_v59, %v3138_v55 }
 0x1e1   : > { %v1821_v19 = vpop.f32.mrf.mxu2 }
 0x1e2   : > { %v1853_v10 = vadd.f32 %v1821_v19, %v1725_v16  ;;  %v5156_v42 = vpop.f32.mrf.mxu0  ;;  %3993 = vmatmul.msk.f32.gmra.mxu3 %vm231_vm3, %v3985_v4  ;;  %v3140_v16 = vsel %vm3139_vm8, %v4358_v38, %v4359_v25  ;;  %v396_v19 = vadd.f32 %v4824_v46, %v4782_v23 }
 0x1e3   : > { %5446 = vst [vmem:[#allocation13_spill] sm:$0xff] %v5156_v42  ;;  %v5162_v27 = vpop.f32.mrf.mxu1 }
 0x1e4   : > { %5447 = vst [vmem:[#allocation14_spill] sm:$0xff] %v5162_v27  ;;  %v567_v27 = vadd.f32 %v4856_v9, %v373_v5  ;;  %v568_v25 = vadd.f32 %v4862_v11, %v396_v19  ;;  %v4362_v9 = vpop.permute.xlu0 %4361  ;;  %v376_v11 = vadd.f32 %v4839_v56, %v4801_v31 }
 0x1e5   : > { %3996 = vmatmul.msk.f32.vlgmr.msrb.gmra.mxu0 %vm231_vm3, %v3994_v26  ;;  %v1844_v60 = vpop.f32.mrf.mxu3 }
 0x1e6   : > { %3998 = vmatmul.msk.f32.vlgmr.msrb.gmra.mxu1 %vm231_vm3, %v3994_v26  ;;  %4000 = vmatmul.msk.f32.vlgmr.msrb.gmra.mxu2 %vm231_vm3, %v3994_v26  ;;  %v1854_v4 = vadd.f32 %v1844_v60, %v1726_v63  ;;  %v695_v23 = vadd.f32 %v4888_v28, %v567_v27  ;;  %v696_v46 = vadd.f32 %v4894_v30, %v568_v25  ;;  %v4367_v63 = vpop.permute.xlu2 %4366  ;;  %v3266_v25 = vpop.permute.xlu1 %3265 }
 0x1e7   : > { %3192 = vmatpush.msrb.mxu1 %v3141_v1  ;;  %3215 = vmatpush.msrb.mxu2 %v3142_v45  ;;  %v399_v30 = vadd.f32 %v4845_v58, %v4807_v35  ;;  %v571_v27 = vadd.f32 %v4875_v20, %v376_v11  ;;  %v4368_v55 = vunpack.i.l.bf16 %v4367_v63  ;;  %v4004_v58 = vld [vmem:[%s5432_s1 + $0x160] sm:$0xff] }
 0x1e8   : > { %3169 = vmatpush.msrb.mxu0 %v3140_v16  ;;  %v823_v1 = vadd.f32 %v4916_v50, %v695_v23  ;;  %v824_v59 = vadd.f32 %v4922_v52, %v696_v46  ;;  %v4364_v50 = vunpack.i.h.bf16 %v4362_v9 }
 0x1e9   : > { %v1927_v42 = vpop.f32.mrf.mxu2  ;;  %v572_v52 = vadd.f32 %v4881_v24, %v399_v30  ;;  %v699_v20 = vadd.f32 %v4904_v39, %v571_v27  ;;  %v5449_v27 = vld [vmem:[#allocation6_spill] sm:$0xff] }
 0x1ea   : > { %v5177_v38 = vadd.f32 %v1927_v42, %v1849_v47  ;;  %v5179_v36 = vpop.f32.mrf.mxu0  ;;  %4002 = vmatmul.msk.f32.vlgmr.msrb.gmra.mxu3 %vm231_vm3, %v3994_v26  ;;  %v951_v31 = vadd.f32 %v4942_v18, %v823_v1  ;;  %v952_v56 = vadd.f32 %v4948_v21, %v824_v59  ;;  %v4363_v42 = vunpack.i.l.bf16 %v4362_v9 }
 0x1eb   : > { %v5186_v44 = vpop.f32.mrf.mxu1  ;;  %3238 = vmatpush.msrb.mxu3 %v3143_v29  ;;  %v4369_v26 = vunpack.i.h.bf16 %v4367_v63  ;;  %v700_v24 = vadd.f32 %v4910_v41, %v572_v52  ;;  %v827_v5 = vadd.f32 %v4931_v2, %v699_v20  ;;  %v3271_v23 = vsel %vm3267_vm9, %v4364_v50, %v3266_v25  ;;  %v5452_v52 = vld [vmem:[#allocation7_spill] sm:$0xff] }
 0x1ec   : > { %v1079_v45 = vadd.f32 %v4968_v54, %v951_v31  ;;  %v4372_v1 = vpop.permute.xlu0 %4371  ;;  %v5450_v31 = vld [vmem:[#allocation13_spill] sm:$0xff]  ;;  %v5456_v25 = vld [vmem:[#allocation11_spill] sm:$0xff] }
 0x1ed   : > { %3997 = vmatmul.msk.f32.gmra.mxu0 %vm231_vm3, %v3995_v22  ;;  %v1950_v47 = vpop.f32.mrf.mxu3  ;;  %v828_v19 = vadd.f32 %v4937_v6, %v700_v24  ;;  %v3268_v41 = vsel %vm3267_vm9, %v4368_v55, %v4369_v26  ;;  %v955_v2 = vadd.f32 %v4957_v40, %v827_v5 }
 0x1ee   : > { %3999 = vmatmul.msk.f32.gmra.mxu1 %vm231_vm3, %v3995_v22  ;;  %4001 = vmatmul.msk.f32.gmra.mxu2 %vm231_vm3, %v3995_v22  ;;  %v5196_v28 = vadd.f32 %v1950_v47, %v1850_v48  ;;  %v1080_v48 = vadd.f32 %v4974_v57, %v952_v56  ;;  %v1207_v18 = vadd.f32 %v4994_v34, %v1079_v45  ;;  %v4377_v30 = vpop.permute.xlu2 %4376  ;;  %v5451_v56 = vld [vmem:[#allocation14_spill] sm:$0xff] }
 0x1ef   : > { %v3269_v57 = vsel %vm3267_vm9, %v4369_v26, %v4363_v42  ;;  %v956_v6 = vadd.f32 %v4963_v0, %v828_v19  ;;  %v4379_v26 = vunpack.i.h.bf16 %v4377_v30  ;;  %v4378_v55 = vunpack.i.l.bf16 %v4377_v30 }
 0x1f0   : > { %v1208_v54 = vadd.f32 %v5000_v37, %v1080_v48  ;;  %v1335_v29 = vadd.f32 %v5020_v13, %v1207_v18  ;;  %v5453_v48 = vld [vmem:[#allocation8_spill] sm:$0xff]  ;;  %v4014_v18 = vld [vmem:[%s5432_s1 + $0x170] sm:$0xff] }
 0x1f1   : > { %v1930_v60 = vpop.f32.mrf.mxu2  ;;  %v1084_v46 = vadd.f32 %v4989_v32, %v956_v6  ;;  %v5457_v6 = vld [vmem:[#allocation12_spill] sm:$0xff] }
 0x1f2   : > { %v5206_v16 = vadd.f32 %v1930_v60, %v1853_v10  ;;  %v5208_v35 = vpop.f32.mrf.mxu0  ;;  %4003 = vmatmul.msk.f32.gmra.mxu3 %vm231_vm3, %v3995_v22  ;;  %v3270_v10 = vsel %vm3267_vm9, %v4363_v42, %v4364_v50  ;;  %v1336_v34 = vadd.f32 %v5026_v15, %v1208_v54  ;;  %v1463_v13 = vadd.f32 %v5049_v7, %v1335_v29  ;;  %v5454_v54 = vld [vmem:[#allocation9_spill] sm:$0xff] }
 0x1f3   : > { %v2042_v21 = vpop.f32.mrf.mxu1  ;;  %v1083_v15 = vadd.f32 %v4983_v12, %v955_v2  ;;  %v1212_v12 = vadd.f32 %v5015_v53, %v1084_v46  ;;  %v4374_v50 = vunpack.i.h.bf16 %v4372_v1  ;;  %v4373_v42 = vunpack.i.l.bf16 %v4372_v1 }
 0x1f4   : > { %v1464_v22 = vadd.f32 %v5055_v14, %v1336_v34  ;;  %v4005_v14 = vld [vmem:[%s5432_s1 + $0x168] sm:$0xf]  ;;  %v3394_v34 = vpop.permute.xlu1 %3393  ;;  %v3396_v2 = vsel %vm3395_vm10, %v4378_v55, %v4379_v26 }
 0x1f5   : > { %4006 = vmatmul.msk.f32.vlgmr.msra.gmra.mxu0 %vm231_vm3, %v4004_v58  ;;  %v1953_v39 = vpop.f32.mrf.mxu3  ;;  %v1211_v11 = vadd.f32 %v5009_v49, %v1083_v15  ;;  %v1340_v47 = vadd.f32 %v5044_v43, %v1212_v12  ;;  %v3399_v46 = vsel %vm3395_vm10, %v4374_v50, %v3394_v34 }
 0x1f6   : > { %4008 = vmatmul.msk.f32.vlgmr.msra.gmra.mxu1 %vm231_vm3, %v4004_v58  ;;  %4010 = vmatmul.msk.f32.vlgmr.msra.gmra.mxu2 %vm231_vm3, %v4004_v58  ;;  %v5228_v37 = vadd.f32 %v1953_v39, %v1854_v4  ;;  %v1591_v4 = vadd.f32 %v5078_v61, %v1463_v13  ;;  %v1592_v40 = vadd.f32 %v5084_v17, %v1464_v22 }
 0x1f7   : > { %3320 = vmatpush.msra.mxu1 %v3269_v57  ;;  %3343 = vmatpush.msra.mxu2 %v3270_v10  ;;  %v3397_v39 = vsel %vm3395_vm10, %v4379_v26, %v4373_v42 }
 0x1f8   : > { %3297 = vmatpush.msra.mxu0 %v3268_v41  ;;  %v1719_v32 = vadd.f32 %v5104_v33, %v1591_v4  ;;  %v1720_v17 = vadd.f32 %v5110_v3, %v1592_v40  ;;  %v5448_v33 = vld [vmem:[#allocation5_spill] sm:$0xff] }
 0x1f9   : > { %v2065_v9 = vpop.f32.mrf.mxu2 }
 0x1fa   : > { %v5240_v0 = vadd.f32 %v2065_v9, %v5177_v38  ;;  %v2022_v7 = vpop.f32.mrf.mxu0  ;;  %4012 = vmatmul.msk.f32.vlgmr.msra.gmra.mxu3 %vm231_vm3, %v4004_v58  ;;  %v1339_v38 = vadd.f32 %v5038_v51, %v1211_v11  ;;  %v1847_v63 = vadd.f32 %v5130_v62, %v1719_v32  ;;  %v1848_v49 = vadd.f32 %v5136_v8, %v1720_v17 }
 0x1fb   : > { %v2045_v61 = vpop.f32.mrf.mxu1  ;;  %3366 = vmatpush.msra.mxu3 %v3271_v23  ;;  %v1468_v51 = vadd.f32 %v5449_v27, %v1340_v47 }
 0x1fc   : > { %v1467_v3 = vadd.f32 %v5448_v33, %v1339_v38  ;;  %v1956_v43 = vadd.f32 %v5450_v31, %v1847_v63  ;;  %v1957_v62 = vadd.f32 %v5451_v56, %v1848_v49  ;;  %v4024_v49 = vld [vmem:[%s5432_s1 + $0x180] sm:$0xff] }
 0x1fd   : > { %4007 = vmatmul.msk.f32.gmra.mxu0 %vm231_vm3, %v4005_v14  ;;  %v2088_v59 = vpop.f32.mrf.mxu3 }
 0x1fe   : > { %4009 = vmatmul.msk.f32.gmra.mxu1 %vm231_vm3, %v4005_v14  ;;  %4011 = vmatmul.msk.f32.gmra.mxu2 %vm231_vm3, %v4005_v14  ;;  %v2097_v53 = vadd.f32 %v2088_v59, %v5196_v28  ;;  %v1595_v45 = vadd.f32 %v5452_v52, %v1467_v3  ;;  %v2094_v8 = vadd.f32 %v5208_v35, %v1956_v43  ;;  %v5455_v35 = vld [vmem:[#allocation10_spill] sm:$0xff]  ;;  %v3522_v43 = vpop.permute.xlu1 %3521 }
 0x1ff   : > { %v1596_v28 = vadd.f32 %v5453_v48, %v1468_v51  ;;  %v2095_v58 = vadd.f32 %v2042_v21, %v1957_v62  ;;  %v3398_v21 = vsel %vm3395_vm10, %v4373_v42, %v4374_v50 }
 0x200   : > { %v1723_v57 = vadd.f32 %v5454_v54, %v1595_v45  ;;  %v4025_v45 = vld [vmem:[%s5432_s1 + $0x188] sm:$0xf]  ;;  %v4487_v54 = vmov 0  }
 0x201   : > { %v2068_v60 = vpop.f32.mrf.mxu2  ;;  %v1724_v19 = vadd.f32 %v5455_v35, %v1596_v28  ;;  %4390 = vset.pattern.permute.xlu0 %v4487_v54  ;;  %4391 = vset.pattern.permute.xlu1 %v4487_v54 }
 0x202   : > { %v2100_v20 = vadd.f32 %v2068_v60, %v5206_v16  ;;  %v2147_v24 = vpop.f32.mrf.mxu0  ;;  %4013 = vmatmul.msk.f32.gmra.mxu3 %vm231_vm3, %v4005_v14  ;;  %v1851_v16 = vadd.f32 %v5456_v25, %v1723_v57  ;;  %v3638_v57 = vld [vmem:[%s5433_s2] sm:$0xff]  ;;  %4392 = vset.pattern.permute.xlu2 %v4487_v54 }
 0x203   : > { %v2222_v10 = vadd.f32 %v2147_v24, %v2094_v8  ;;  %v2170_v5 = vpop.f32.mrf.mxu1  ;;  %v1852_v13 = vadd.f32 %v5457_v6, %v1724_v19  ;;  %3642 = vperm.xlu0 %4390, %v3638_v57   ;;  %v3639_v19 = vld [vmem:[%s5433_s2 + $0x8] sm:$0xf] }
 0x204   : > { %v2223_v29 = vadd.f32 %v2170_v5, %v2095_v58  ;;  %v1960_v23 = vadd.f32 %v5179_v36, %v1851_v16  ;;  %3647 = vperm.xlu1 %4391, %v3639_v19  }
 0x205   : > { %4016 = vmatmul.msk.f32.vlgmr.msrb.gmra.mxu0 %vm231_vm3, %v4014_v18  ;;  %v2091_v41 = vpop.f32.mrf.mxu3  ;;  %v1961_v15 = vadd.f32 %v5186_v44, %v1852_v13  ;;  %v3667_v13 = vld [vmem:[%s5434_s3 + $0x8] sm:$0xf] }
 0x206   : > { %4018 = vmatmul.msk.f32.vlgmr.msrb.gmra.mxu1 %vm231_vm3, %v4014_v18  ;;  %4020 = vmatmul.msk.f32.vlgmr.msrb.gmra.mxu2 %vm231_vm3, %v4014_v18  ;;  %v2101_v22 = vadd.f32 %v2091_v41, %v5228_v37  ;;  %v2098_v4 = vadd.f32 %v2022_v7, %v1960_v23  ;;  %v4015_v37 = vld [vmem:[%s5432_s1 + $0x178] sm:$0xf]  ;;  %v4387_v7 = vpop.permute.xlu2 %4386 }
 0x207   : > { %3448 = vmatpush.msrb.mxu1 %v3397_v39  ;;  %3471 = vmatpush.msrb.mxu2 %v3398_v21  ;;  %v2099_v40 = vadd.f32 %v2045_v61, %v1961_v15  ;;  %v4382_v44 = vpop.permute.xlu0 %4381  ;;  %v4389_v38 = vunpack.i.h.bf16 %v4387_v7  ;;  %v4388_v63 = vunpack.i.l.bf16 %v4387_v7  ;;  %v4035_v41 = vld [vmem:[%s5432_s1 + $0x198] sm:$0xf] }
 0x208   : > { %3425 = vmatpush.msrb.mxu0 %v3396_v2  ;;  %v4384_v61 = vunpack.i.h.bf16 %v4382_v44  ;;  %v4383_v1 = vunpack.i.l.bf16 %v4382_v44 }
 0x209   : > { %v2193_v9 = vpop.f32.mrf.mxu2  ;;  %v3524_v56 = vsel %vm3523_vm11, %v4388_v63, %v4389_v38 }
 0x20a   : > { %v2224_v14 = vadd.f32 %v2193_v9, %v5240_v0  ;;  %v2150_v11 = vpop.f32.mrf.mxu0  ;;  %4022 = vmatmul.msk.f32.vlgmr.msrb.gmra.mxu3 %vm231_vm3, %v4014_v18  ;;  %v3525_v51 = vsel %vm3523_vm11, %v4389_v38, %v4383_v1  ;;  %v3527_v50 = vsel %vm3523_vm11, %v4384_v61, %v3522_v43  ;;  %v4034_v18 = vld [vmem:[%s5432_s1 + $0x190] sm:$0xff]  ;;  %v4044_v9 = vld [vmem:[%s5432_s1 + $0x1a0] sm:$0xff] }
 0x20b   : > { %v2226_v36 = vadd.f32 %v2150_v11, %v2098_v4  ;;  %v2173_v12 = vpop.f32.mrf.mxu1  ;;  %3494 = vmatpush.msrb.mxu3 %v3399_v46 }
 0x20c   : > { %v2227_v32 = vadd.f32 %v2173_v12, %v2099_v40  ;;  %3675 = vperm.xlu1 %4391, %v3667_v13  }
 0x20d   : > { %4017 = vmatmul.msk.f32.gmra.mxu0 %vm231_vm3, %v4015_v37  ;;  %v2216_v17 = vpop.f32.mrf.mxu3 }
 0x20e   : > { %4019 = vmatmul.msk.f32.gmra.mxu1 %vm231_vm3, %v4015_v37  ;;  %4021 = vmatmul.msk.f32.gmra.mxu2 %vm231_vm3, %v4015_v37  ;;  %v2225_v0 = vadd.f32 %v2216_v17, %v2097_v53  ;;  %v3526_v53 = vsel %vm3523_vm11, %v4383_v1, %v4384_v61  ;;  %v4045_v17 = vld [vmem:[%s5432_s1 + $0x1a8] sm:$0xf]  ;;  %v3666_v1 = vld [vmem:[%s5434_s3] sm:$0xff] }
 0x20f   : > { %3670 = vperm.xlu2 %4392, %v3666_v1  }
 0x211   : > { %v2196_v47 = vpop.f32.mrf.mxu2 }
 0x212   : > { %v2228_v59 = vadd.f32 %v2196_v47, %v2100_v20  ;;  %v2275_v30 = vpop.f32.mrf.mxu0  ;;  %4023 = vmatmul.msk.f32.gmra.mxu3 %vm231_vm3, %v4015_v37 }
 0x213   : > { %v2350_v33 = vadd.f32 %v2275_v30, %v2222_v10  ;;  %v2298_v3 = vpop.f32.mrf.mxu1 }
 0x214   : > { %v2351_v27 = vadd.f32 %v2298_v3, %v2223_v29 }
 0x215   : > { %4026 = vmatmul.msk.f32.vlgmr.msra.gmra.mxu0 %vm231_vm3, %v4024_v49  ;;  %v2219_v31 = vpop.f32.mrf.mxu3 }
 0x216   : > { %4028 = vmatmul.msk.f32.vlgmr.msra.gmra.mxu1 %vm231_vm3, %v4024_v49  ;;  %4030 = vmatmul.msk.f32.vlgmr.msra.gmra.mxu2 %vm231_vm3, %v4024_v49  ;;  %v2229_v62 = vadd.f32 %v2219_v31, %v2101_v22 }
 0x217   : > { %3576 = vmatpush.msra.mxu1 %v3525_v51  ;;  %3599 = vmatpush.msra.mxu2 %v3526_v53 }
 0x218   : > { %3553 = vmatpush.msra.mxu0 %v3524_v56 }
 0x219   : > { %v2321_v42 = vpop.f32.mrf.mxu2 }
 0x21a   : > { %v2352_v26 = vadd.f32 %v2321_v42, %v2224_v14  ;;  %v2278_v52 = vpop.f32.mrf.mxu0  ;;  %4032 = vmatmul.msk.f32.vlgmr.msra.gmra.mxu3 %vm231_vm3, %v4024_v49 }
 0x21b   : > { %v2354_v8 = vadd.f32 %v2278_v52, %v2226_v36  ;;  %v2301_v60 = vpop.f32.mrf.mxu1  ;;  %3622 = vmatpush.msra.mxu3 %v3527_v50 }
 0x21c   : > { %v2355_v55 = vadd.f32 %v2301_v60, %v2227_v32 }
 0x21d   : > { %4027 = vmatmul.msk.f32.gmra.mxu0 %vm231_vm3, %v4025_v45  ;;  %v2344_v48 = vpop.f32.mrf.mxu3 }
 0x21e   : > { %4029 = vmatmul.msk.f32.gmra.mxu1 %vm231_vm3, %v4025_v45  ;;  %4031 = vmatmul.msk.f32.gmra.mxu2 %vm231_vm3, %v4025_v45  ;;  %v2353_v28 = vadd.f32 %v2344_v48, %v2225_v0 }
 0x221   : > { %v2324_v58 = vpop.f32.mrf.mxu2 }
 0x222   : > { %v2356_v20 = vadd.f32 %v2324_v58, %v2228_v59  ;;  %v2403_v24 = vpop.f32.mrf.mxu0  ;;  %4033 = vmatmul.msk.f32.gmra.mxu3 %vm231_vm3, %v4025_v45 }
 0x223   : > { %v2478_v10 = vadd.f32 %v2403_v24, %v2350_v33  ;;  %v2426_v5 = vpop.f32.mrf.mxu1 }
 0x224   : > { %v2479_v35 = vadd.f32 %v2426_v5, %v2351_v27 }
 0x225   : > { %4036 = vmatmul.msk.f32.vlgmr.msrb.gmra.mxu0 %vm231_vm3, %v4034_v18  ;;  %v2347_v29 = vpop.f32.mrf.mxu3 }
 0x226   : > { %4038 = vmatmul.msk.f32.vlgmr.msrb.gmra.mxu1 %vm231_vm3, %v4034_v18  ;;  %4040 = vmatmul.msk.f32.vlgmr.msrb.gmra.mxu2 %vm231_vm3, %v4034_v18  ;;  %v2357_v39 = vadd.f32 %v2347_v29, %v2229_v62 }
 0x229   : > { %v2449_v21 = vpop.f32.mrf.mxu2 }
 0x22a   : > { %v2480_v25 = vadd.f32 %v2449_v21, %v2352_v26  ;;  %v2406_v16 = vpop.f32.mrf.mxu0  ;;  %4042 = vmatmul.msk.f32.vlgmr.msrb.gmra.mxu3 %vm231_vm3, %v4034_v18 }
 0x22b   : > { %v2482_v34 = vadd.f32 %v2406_v16, %v2354_v8  ;;  %v2429_v2 = vpop.f32.mrf.mxu1 }
 0x22c   : > { %v2483_v6 = vadd.f32 %v2429_v2, %v2355_v55 }
 0x22d   : > { %4037 = vmatmul.msk.f32.gmra.mxu0 %vm231_vm3, %v4035_v41  ;;  %v2472_v22 = vpop.f32.mrf.mxu3 }
 0x22e   : > { %4039 = vmatmul.msk.f32.gmra.mxu1 %vm231_vm3, %v4035_v41  ;;  %4041 = vmatmul.msk.f32.gmra.mxu2 %vm231_vm3, %v4035_v41  ;;  %v2481_v23 = vadd.f32 %v2472_v22, %v2353_v28 }
 0x231   : > { %v2452_v15 = vpop.f32.mrf.mxu2 }
 0x232   : > { %v2484_v46 = vadd.f32 %v2452_v15, %v2356_v20  ;;  %v2531_v4 = vpop.f32.mrf.mxu0  ;;  %4043 = vmatmul.msk.f32.gmra.mxu3 %vm231_vm3, %v4035_v41 }
 0x233   : > { %v2606_v40 = vadd.f32 %v2531_v4, %v2478_v10  ;;  %v2554_v14 = vpop.f32.mrf.mxu1 }
 0x234   : > { %v2607_v11 = vadd.f32 %v2554_v14, %v2479_v35 }
 0x235   : > { %4046 = vmatmul.msk.f32.vlgmr.msra.gmra.mxu0 %vm231_vm3, %v4044_v9  ;;  %v2475_v37 = vpop.f32.mrf.mxu3 }
 0x236   : > { %4048 = vmatmul.msk.f32.vlgmr.msra.gmra.mxu1 %vm231_vm3, %v4044_v9  ;;  %4050 = vmatmul.msk.f32.vlgmr.msra.gmra.mxu2 %vm231_vm3, %v4044_v9  ;;  %v2485_v36 = vadd.f32 %v2475_v37, %v2357_v39 }
 0x239   : > { %v2577_v12 = vpop.f32.mrf.mxu2 }
 0x23a   : > { %v2608_v32 = vadd.f32 %v2577_v12, %v2480_v25  ;;  %v2534_v44 = vpop.f32.mrf.mxu0  ;;  %4052 = vmatmul.msk.f32.vlgmr.msra.gmra.mxu3 %vm231_vm3, %v4044_v9 }
 0x23b   : > { %v2610_v7 = vadd.f32 %v2534_v44, %v2482_v34  ;;  %v2557_v0 = vpop.f32.mrf.mxu1 }
 0x23c   : > { %v2611_v61 = vadd.f32 %v2557_v0, %v2483_v6 }
 0x23d   : > { %4047 = vmatmul.msk.f32.gmra.mxu0 %vm231_vm3, %v4045_v17  ;;  %v2600_v38 = vpop.f32.mrf.mxu3 }
 0x23e   : > { %4049 = vmatmul.msk.f32.gmra.mxu1 %vm231_vm3, %v4045_v17  ;;  %4051 = vmatmul.msk.f32.gmra.mxu2 %vm231_vm3, %v4045_v17  ;;  %v2609_v47 = vadd.f32 %v2600_v38, %v2481_v23 }
 0x241   : > { %v2580_v63 = vpop.f32.mrf.mxu2 }
 0x242   : > { %v2612_v59 = vadd.f32 %v2580_v63, %v2484_v46  ;;  %v2659_v30 = vpop.f32.mrf.mxu0  ;;  %4053 = vmatmul.msk.f32.gmra.mxu3 %vm231_vm3, %v4045_v17 }
 0x243   : > { %v2734_v49 = vadd.f32 %v2659_v30, %v2606_v40  ;;  %v2682_v33 = vpop.f32.mrf.mxu1 }
 0x244   : > { %v2735_v3 = vadd.f32 %v2682_v33, %v2607_v11 }
 0x245   : > { %v2603_v27 = vpop.f32.mrf.mxu3 }
 0x246   : > { %v2613_v51 = vadd.f32 %v2603_v27, %v2485_v36 }
 0x249   : > { %v2705_v53 = vpop.f32.mrf.mxu2 }
 0x24a   : > { %v2736_v31 = vadd.f32 %v2705_v53, %v2608_v32  ;;  %v2662_v43 = vpop.f32.mrf.mxu0 }
 0x24b   : > { %v2738_v56 = vadd.f32 %v2662_v43, %v2610_v7  ;;  %v2685_v62 = vpop.f32.mrf.mxu1 }
 0x24c   : > { %v2739_v50 = vadd.f32 %v2685_v62, %v2611_v61 }
 0x24d   : > { %v2728_v42 = vpop.f32.mrf.mxu3 }
 0x24e   : > { %v2737_v26 = vadd.f32 %v2728_v42, %v2609_v47 }
 0x251   : > { %v2708_v52 = vpop.f32.mrf.mxu2 }
 0x252   : > { %v2740_v45 = vadd.f32 %v2708_v52, %v2612_v59  ;;  %v2787_v8 = vpop.f32.mrf.mxu0 }
 0x253   : > { %v2862_v60 = vadd.f32 %v2787_v8, %v2734_v49  ;;  %v2810_v55 = vpop.f32.mrf.mxu1 }
 0x254   : > { %v2863_v48 = vadd.f32 %v2810_v55, %v2735_v3 }
 0x255   : > { %v2731_v28 = vpop.f32.mrf.mxu3 }
 0x256   : > { %v2741_v58 = vadd.f32 %v2731_v28, %v2613_v51 }
 0x259   : > { %v2833_v20 = vpop.f32.mrf.mxu2 }
 0x25a   : > { %v2864_v24 = vadd.f32 %v2833_v20, %v2736_v31  ;;  %v2790_v18 = vpop.f32.mrf.mxu0 }
 0x25b   : > { %v2866_v54 = vadd.f32 %v2790_v18, %v2738_v56  ;;  %v2813_v57 = vpop.f32.mrf.mxu1 }
 0x25c   : > { %v2867_v10 = vadd.f32 %v2813_v57, %v2739_v50 }
 0x25d   : > { %v2856_v5 = vpop.f32.mrf.mxu3 }
 0x25e   : > { %v2865_v35 = vadd.f32 %v2856_v5, %v2737_v26 }
 0x261   : > { %v2836_v19 = vpop.f32.mrf.mxu2 }
 0x262   : > { %v2868_v29 = vadd.f32 %v2836_v19, %v2740_v45  ;;  %v2915_v39 = vpop.f32.mrf.mxu0 }
 0x263   : > { %v2990_v21 = vadd.f32 %v2915_v39, %v2862_v60  ;;  %v2938_v25 = vpop.f32.mrf.mxu1 }
 0x264   : > { %v2991_v16 = vadd.f32 %v2938_v25, %v2863_v48 }
 0x265   : > { %v2859_v41 = vpop.f32.mrf.mxu3 }
 0x266   : > { %v2869_v34 = vadd.f32 %v2859_v41, %v2741_v58 }
 0x269   : > { %v2961_v2 = vpop.f32.mrf.mxu2 }
 0x26a   : > { %v2992_v6 = vadd.f32 %v2961_v2, %v2864_v24  ;;  %v2918_v13 = vpop.f32.mrf.mxu0 }
 0x26b   : > { %v2994_v22 = vadd.f32 %v2918_v13, %v2866_v54  ;;  %v2941_v23 = vpop.f32.mrf.mxu1 }
 0x26c   : > { %v2995_v15 = vadd.f32 %v2941_v23, %v2867_v10 }
 0x26d   : > { %v2984_v46 = vpop.f32.mrf.mxu3 }
 0x26e   : > { %v2993_v4 = vadd.f32 %v2984_v46, %v2865_v35 }
 0x271   : > { %v2964_v9 = vpop.f32.mrf.mxu2 }
 0x272   : > { %v5351_v40 = vadd.f32 %v2964_v9, %v2868_v29  ;;  %v3043_v14 = vpop.f32.mrf.mxu0 }
 0x273   : > { %v3066_v11 = vpop.f32.mrf.mxu1  ;;  %v3118_v52 = vadd.f32 %v3043_v14, %v2990_v21 }
 0x274   : > { %v3119_v8 = vadd.f32 %v3066_v11, %v2991_v16  ;;  %v3671_v16 = vpop.permute.xlu2 %3670 }
 0x275   : > { %v2987_v37 = vpop.f32.mrf.mxu3  ;;  %v5365_v18 = vpop.permute.xlu0 %3642 }
 0x276   : > { %v5353_v36 = vadd.f32 %v2987_v37, %v2869_v34  ;;  %v5368_v5 = vpop.permute.xlu1 %3647 }
 0x279   : > { %v3089_v12 = vpop.f32.mrf.mxu2 }
 0x27a   : > { %v3046_v32 = vpop.f32.mrf.mxu0  ;;  %v3120_v54 = vadd.f32 %v3089_v12, %v2992_v6 }
 0x27b   : > { %v3069_v44 = vpop.f32.mrf.mxu1  ;;  %v3122_v35 = vadd.f32 %v3046_v32, %v2994_v22 }
 0x27c   : > { %v3123_v39 = vadd.f32 %v3069_v44, %v2995_v15 }
 0x27d   : > { %v3112_v17 = vpop.f32.mrf.mxu3 }
 0x27e   : > { %v3121_v41 = vadd.f32 %v3112_v17, %v2993_v4 }
 0x281   : > { %v3092_v7 = vpop.f32.mrf.mxu2 }
 0x282   : > { %v3171_v0 = vpop.f32.mrf.mxu0  ;;  %v3124_v12 = vadd.f32 %v3092_v7, %v5351_v40 }
 0x283   : > { %v3194_v61 = vpop.f32.mrf.mxu1  ;;  %v3246_v60 = vadd.f32 %v3171_v0, %v3118_v52 }
 0x284   : > { %v3247_v48 = vadd.f32 %v3194_v61, %v3119_v8 }
 0x285   : > { %v5355_v1 = vpop.f32.mrf.mxu3 }
 0x289   : > { %v3217_v38 = vpop.f32.mrf.mxu2 }
 0x28a   : > { %v3174_v47 = vpop.f32.mrf.mxu0  ;;  %v3248_v21 = vadd.f32 %v3217_v38, %v3120_v54 }
 0x28b   : > { %v3197_v63 = vpop.f32.mrf.mxu1  ;;  %v3250_v34 = vadd.f32 %v3174_v47, %v3122_v35 }
 0x28c   : > { %v3251_v23 = vadd.f32 %v3197_v63, %v3123_v39 }
 0x28d   : > { %v3240_v59 = vpop.f32.mrf.mxu3 }
 0x28e   : > { %v3249_v9 = vadd.f32 %v3240_v59, %v3121_v41 }
 0x291   : > { %v5357_v30 = vpop.f32.mrf.mxu2 }
 0x292   : > { %v3299_v49 = vpop.f32.mrf.mxu0  ;;  %v3252_v63 = vadd.f32 %v5357_v30, %v3124_v12 }
 0x293   : > { %v3322_v33 = vpop.f32.mrf.mxu1  ;;  %v3374_v28 = vadd.f32 %v3299_v49, %v3246_v60 }
 0x294   : > { %v3375_v58 = vadd.f32 %v3322_v33, %v3247_v48 }
 0x295   : > { %v5359_v3 = vpop.f32.mrf.mxu3 }
 0x299   : > { %v3345_v27 = vpop.f32.mrf.mxu2 }
 0x29a   : > { %v3302_v51 = vpop.f32.mrf.mxu0  ;;  %v3376_v6 = vadd.f32 %v3345_v27, %v3248_v21  ;;  %v3676_v27 = vpop.permute.xlu1 %3675 }
 0x29b   : > { %v3325_v53 = vpop.f32.mrf.mxu1  ;;  %v3378_v14 = vadd.f32 %v3302_v51, %v3250_v34  ;;  %v3125_v51 = vadd.f32 %v5355_v1, %v5353_v36 }
 0x29c   : > { %v3379_v11 = vadd.f32 %v3325_v53, %v3251_v23 }
 0x29d   : > { %v3368_v31 = vpop.f32.mrf.mxu3 }
 0x29e   : > { %v3377_v17 = vadd.f32 %v3368_v31, %v3249_v9 }
 0x2a1   : > { %v5361_v43 = vpop.f32.mrf.mxu2 }
 0x2a2   : > { %v3427_v56 = vpop.f32.mrf.mxu0  ;;  %v3380_v53 = vadd.f32 %v5361_v43, %v3252_v63 }
 0x2a3   : > { %v3450_v62 = vpop.f32.mrf.mxu1  ;;  %v3502_v20 = vadd.f32 %v3427_v56, %v3374_v28 }
 0x2a4   : > { %v3503_v57 = vadd.f32 %v3450_v62, %v3375_v58 }
 0x2a5   : > { %v5363_v50 = vpop.f32.mrf.mxu3 }
 0x2a9   : > { %v3473_v42 = vpop.f32.mrf.mxu2 }
 0x2aa   : > { %v3430_v26 = vpop.f32.mrf.mxu0  ;;  %v3504_v15 = vadd.f32 %v3473_v42, %v3376_v6 }
 0x2ab   : > { %v3453_v45 = vpop.f32.mrf.mxu1  ;;  %v3506_v32 = vadd.f32 %v3430_v26, %v3378_v14  ;;  %v3253_v26 = vadd.f32 %v5359_v3, %v3125_v51 }
 0x2ac   : > { %v3507_v0 = vadd.f32 %v3453_v45, %v3379_v11 }
 0x2ad   : > { %v3496_v55 = vpop.f32.mrf.mxu3  ;;  %v3381_v8 = vadd.f32 %v5363_v50, %v3253_v26 }
 0x2ae   : > { %v3505_v33 = vadd.f32 %v3496_v55, %v3377_v17 }
 0x2b1   : > { %v3476_v24 = vpop.f32.mrf.mxu2 }
 0x2b2   : > { %v3555_v10 = vpop.f32.mrf.mxu0  ;;  %v3508_v52 = vadd.f32 %v3476_v24, %v3380_v53 }
 0x2b3   : > { %v3630_v19 = vadd.f32 %v3555_v10, %v3502_v20  ;;  %v3578_v29 = vpop.f32.mrf.mxu1 }
 0x2b4   : > { %v3631_v25 = vadd.f32 %v3578_v29, %v3503_v57 }
 0x2b5   : > { %v3650_v2 = vadd.f32 %v5365_v18, %v3630_v19  ;;  %v3499_v13 = vpop.f32.mrf.mxu3 }
 0x2b6   : > { %v3651_v46 = vadd.f32 %v5365_v18, %v3631_v25  ;;  %v3509_v58 = vadd.f32 %v3499_v13, %v3381_v8 }
 0x2b7   : > { %vm3658_vm3 = vcmp.gt.f32.partialorder %v3650_v2, 0.0  ;;  %v3678_v22 = vmul.f32 %v3671_v16, %v3650_v2 }
 0x2b8   : > { %vm3659_vm12 = vcmp.gt.f32.partialorder %v3651_v46, 0.0  ;;  %v3679_v37 = vmul.f32 %v3671_v16, %v3651_v46 }
 0x2b9   : > { %v3686_v4 = vsel %vm3658_vm3, %v3650_v2, %v3678_v22  ;;  %v3601_v44 = vpop.f32.mrf.mxu2 }
 0x2ba   : > { %v3687_v61 = vsel %vm3659_vm12, %v3651_v46, %v3679_v37  ;;  %3694 = vst [vmem:[%s5375_s29] sm:$0xff] %v3686_v4  ;;  %v3632_v38 = vadd.f32 %v3601_v44, %v3504_v15  ;;  %v3558_v47 = vpop.f32.mrf.mxu0 }
 0x2bb   : > { %3695 = vst [vmem:[%s5375_s29 + $0x8] sm:$0xff] %v3687_v61  ;;  %v3634_v59 = vadd.f32 %v3558_v47, %v3506_v32  ;;  %v3581_v49 = vpop.f32.mrf.mxu1 }
 0x2bc   : > { %v3652_v40 = vadd.f32 %v5365_v18, %v3632_v38  ;;  %v3635_v7 = vadd.f32 %v3581_v49, %v3507_v0 }
 0x2bd   : > { %v3654_v31 = vadd.f32 %v5368_v5, %v3634_v59  ;;  %v3624_v56 = vpop.f32.mrf.mxu3 }
 0x2be   : > { %vm3660_vm13 = vcmp.gt.f32.partialorder %v3652_v40, 0.0  ;;  %v3680_v30 = vmul.f32 %v3671_v16, %v3652_v40  ;;  %v3655_v62 = vadd.f32 %v5368_v5, %v3635_v7  ;;  %v3633_v42 = vadd.f32 %v3624_v56, %v3505_v33 }
 0x2bf   : > { %vm3662_vm14 = vcmp.gt.f32.partialorder %v3654_v31, 0.0  ;;  %v3682_v45 = vmul.f32 %v3676_v27, %v3654_v31 }
 0x2c0   : > { %v3688_v36 = vsel %vm3660_vm13, %v3652_v40, %v3680_v30  ;;  %vm3663_vm15 = vcmp.gt.f32.partialorder %v3655_v62, 0.0  ;;  %v3683_v1 = vmul.f32 %v3676_v27, %v3655_v62  ;;  %v3653_v43 = vadd.f32 %v5365_v18, %v3633_v42 }
 0x2c1   : > { %3696 = vst [vmem:[%s5375_s29 + $0x10] sm:$0xff] %v3688_v36  ;;  %v3690_v60 = vsel %vm3662_vm14, %v3654_v31, %v3682_v45  ;;  %v3604_v55 = vpop.f32.mrf.mxu2 }
 0x2c2   : > { %v3691_v48 = vsel %vm3663_vm15, %v3655_v62, %v3683_v1  ;;  %3698 = vst [vmem:[%s5375_s29 + $0x20] sm:$0xf] %v3690_v60  ;;  %vm3661_vm0 = vcmp.gt.f32.partialorder %v3653_v43, 0.0  ;;  %v3681_v3 = vmul.f32 %v3671_v16, %v3653_v43  ;;  %v3636_v28 = vadd.f32 %v3604_v55, %v3508_v52 }
 0x2c3   : > { %3699 = vst [vmem:[%s5375_s29 + $0x28] sm:$0xf] %v3691_v48 }
 0x2c4   : > { %v3689_v20 = vsel %vm3661_vm0, %v3653_v43, %v3681_v3  ;;  %v3656_v24 = vadd.f32 %v5368_v5, %v3636_v28 }
 0x2c5   : > { %3697 = vst [vmem:[%s5375_s29 + $0x18] sm:$0xff] %v3689_v20  ;;  %v3627_v50 = vpop.f32.mrf.mxu3 }
 0x2c6   : > { %vm3664_vm1 = vcmp.gt.f32.partialorder %v3656_v24, 0.0  ;;  %v3684_v18 = vmul.f32 %v3676_v27, %v3656_v24  ;;  %v3637_v54 = vadd.f32 %v3627_v50, %v3509_v58 }
 0x2c8   : > { %v3692_v57 = vsel %vm3664_vm1, %v3656_v24, %v3684_v18  ;;  %v3657_v10 = vadd.f32 %v5368_v5, %v3637_v54 }
 0x2c9   : > { %3700 = vst [vmem:[%s5375_s29 + $0x30] sm:$0xf] %v3692_v57 }
 0x2ca   : > { %vm3665_vm2 = vcmp.gt.f32.partialorder %v3657_v10, 0.0  ;;  %v3685_v35 = vmul.f32 %v3676_v27, %v3657_v10 }
 0x2cc   : > { %v3693_v19 = vsel %vm3665_vm2, %v3657_v10, %v3685_v35 }
 0x2cd   : > { %3701 = vst [vmem:[%s5375_s29 + $0x38] sm:$0xf] %v3693_v19 }
 0x2ce   : > { %4424 = shalt.err (!%p4421_p3)
}
 0x2cf   : > { %s4488_s23 = smov 512   ;;  %s4489_s27 = smov 2048  }
 0x2d0   : > { %s4490_s28 = smov 32  }
 0x2d1   : > { %4061 = dma.vmem_to_hbm [thread:$0]  (%p4554_p5), %s3716_s19, 1024, %s3718_s10, %s3703_s11, %s4488_s23, %s4489_s27, %s4490_s28  }
 0x2d2 PF: > { %p4067_p4 = scmp.ge.s32.totalorder %s4459_s18, 2  ;;  %s3732_s29 = sand.u32 1, %s4447_s15  }
 0x2d3   : > { %s3733_s30 = scalar_lea.sflag [#allocation3], %s3732_s29 }
 0x2d4   : > { %p4064_p7 = pnand %p4067_p4, %p4558_p6 }
 0x2d6   : > { %p4065_p8 = pneg %p4064_p7 }
 0x2d8   : > { %4442 = dma.done.wait (%p4065_p8), %s3733_s30, 1024  }
 0x2d9   : > { %4444 = vsyncadd (%p4065_p8), %s3733_s30, 4294966272  ;;  %p14_p9 = scmp.ge.s32.totalorder %s4541_s21, 6   ;;  %s5458_s15 = smov %s4451_s16 }
 0x2da   : > { %s5459_s16 = smov %s4455_s17  ;;  %s5460_s17 = smov %s4552_s24 }
 0x2db   : > { %s5461_s18 = smov %s4541_s21  ;;  %16 = sbr.rel (!%p14_p9) target bundleno = 3 (0x3), region = 97 }
 0x2e0   :  { %3739 = vsyncpa [#allocation3], 1 }
 0x2e1   :  { %3741 = vsyncpa [#allocation3 + $0x1], 1 }

</bundles_post_ra>
